<compile_context>
chip_gen: v5e
topology: v5e:2x2
jax: 0.10.0
libtpu: 0.0.40
codegen_flags: <defaults>
</compile_context>

<pallas_src>
import functools

import jax
import jax.numpy as jnp
from jax.experimental import pallas as pl
from jax.experimental.pallas import tpu as pltpu


_VMEM = pl.BlockSpec(memory_space=pltpu.MemorySpace.VMEM)
_SMEM = pl.BlockSpec(memory_space=pltpu.MemorySpace.SMEM)


def _sigmoid(z):
    # explicit form (exp -> EUP); avoids relying on a lax.logistic lowering
    return 1.0 / (1.0 + jnp.exp(-z))


# --------------------------- fused forward kernel ---------------------------

def _make_fused_kernel(num_layers, process_steps, hidden):
    H = hidden

    def kernel(*refs):
        it = iter(refs)
        eps_ref = next(it)                       # SMEM (L,) f32
        adj_ref = next(it)                       # (N, N) bf16
        x0_ref = next(it)                        # (N, F0) f32
        layers = [tuple(next(it) for _ in range(6)) for _ in range(num_layers)]
        s_ref = next(it)                         # (G, N) f32 one-hot batch matrix
        wihq_ref, wihr_ref, whh_ref, bih_ref, bhh_ref = (next(it) for _ in range(5))
        fc1wq_ref, fc1wr_ref, fc1b_ref = (next(it) for _ in range(3))
        fc2w_ref, fc2b_ref = (next(it) for _ in range(2))
        fc3w_ref, fc3b_ref = (next(it) for _ in range(2))
        out_ref = next(it)

        # ---------------- GIN stack + JumpingKnowledge('max') ----------------
        adj = adj_ref[...]                       # bf16, DMA'd once
        h = x0_ref[...]                          # f32
        jk = None
        for l, (w1_ref, b1_ref, w2_ref, b2_ref, bns_ref, bnb_ref) in enumerate(layers):
            eps = eps_ref[l]
            # neighbor sum aggregation on the MXU (bf16 inputs, f32 accumulate)
            agg = jnp.dot(adj, h.astype(jnp.bfloat16),
                          preferred_element_type=jnp.float32)
            pre = (1.0 + eps) * h + agg
            t = jnp.dot(pre.astype(jnp.bfloat16), w1_ref[...],
                        preferred_element_type=jnp.float32) + b1_ref[...]
            t = jnp.maximum(t, 0.0)
            t = jnp.dot(t.astype(jnp.bfloat16), w2_ref[...],
                        preferred_element_type=jnp.float32) + b2_ref[...]
            t = jnp.maximum(t, 0.0)
            h = t * bns_ref[...] + bnb_ref[...]  # eval BatchNorm as affine
            jk = h if jk is None else jnp.maximum(jk, h)

        # --------------------------- Set2Set ---------------------------------
        x = jk                                   # (N, H) f32
        x_t = x.T                                # hoisted, transposed once
        s = s_ref[...]                           # (G, N) 0/1 membership
        G = s.shape[0]
        hh = jnp.zeros((G, H), jnp.float32)
        cc = jnp.zeros((G, H), jnp.float32)
        qq = jnp.zeros((G, H), jnp.float32)      # q half of q_star
        rr = jnp.zeros((G, H), jnp.float32)      # r half of q_star
        wihq = wihq_ref[...]
        wihr = wihr_ref[...]
        whh = whh_ref[...]
        bias = bih_ref[...] + bhh_ref[...]
        for _ in range(process_steps):
            gates = (jnp.dot(qq, wihq, preferred_element_type=jnp.float32)
                     + jnp.dot(rr, wihr, preferred_element_type=jnp.float32)
                     + jnp.dot(hh, whh, preferred_element_type=jnp.float32)
                     + bias)                     # (G, 4H), gate order i|f|g|o
            i_g = _sigmoid(gates[:, 0:H])
            f_g = _sigmoid(gates[:, H:2 * H])
            g_g = jnp.tanh(gates[:, 2 * H:3 * H])
            o_g = _sigmoid(gates[:, 3 * H:4 * H])
            cc = f_g * cc + i_g * g_g
            hh = o_g * jnp.tanh(cc)
            q = hh                               # (G, H)
            # masked per-graph softmax over nodes, done dense
            e = jnp.dot(q, x_t, preferred_element_type=jnp.float32)   # (G, N)
            e = jnp.where(s > 0.5, e, -1e30)
            m = jnp.max(e, axis=1, keepdims=True)
            a = jnp.exp(e - m) * s
            denom = jnp.sum(a, axis=1, keepdims=True)
            a = a / denom
            r = jnp.dot(a, x, preferred_element_type=jnp.float32)     # (G, H)
            qq, rr = q, r

        # ------------------------------ head ---------------------------------
        t = (jnp.dot(qq, fc1wq_ref[...], preferred_element_type=jnp.float32)
             + jnp.dot(rr, fc1wr_ref[...], preferred_element_type=jnp.float32)
             + fc1b_ref[...])
        t = jnp.maximum(t, 0.0)
        t = jnp.dot(t, fc2w_ref[...], preferred_element_type=jnp.float32) + fc2b_ref[...]
        t = jnp.maximum(t, 0.0)
        out_ref[...] = (jnp.dot(t, fc3w_ref[...], preferred_element_type=jnp.float32)
                        + fc3b_ref[...])

    return kernel


# ------------------------------- forward glue --------------------------------

@functools.partial(jax.jit, static_argnames=("num_graphs", "process_step"))
def net_forward(prepped, x, edge_index, batch, num_graphs, process_step):
    # embedding of the first two (integer) feature columns (gather, XLA glue)
    codes = x[:, :2].astype(jnp.int32)                        # (N, 2)
    ems = prepped["embedding"][codes]                         # (N, 2, E)
    ems = ems.reshape(ems.shape[0], -1)
    h0 = jnp.concatenate([ems, x[:, 2:]], axis=1).astype(jnp.float32)

    # dense adjacency A[dst, src] += 1 (scatter, XLA glue); exact in bf16
    n = x.shape[0]
    src, dst = edge_index[0], edge_index[1]
    adj = jnp.zeros((n, n), jnp.float32).at[dst, src].add(1.0)
    adj_bf = adj.astype(jnp.bfloat16)

    # one-hot graph-membership matrix for the in-kernel masked softmax
    s = (batch[None, :] ==
         jnp.arange(num_graphs, dtype=batch.dtype)[:, None]).astype(jnp.float32)

    hidden = prepped["whh"].shape[0]
    num_classes = prepped["fc3_w"].shape[1]
    num_layers = len(prepped["convs"])

    operands = [prepped["eps"], adj_bf, h0]
    for c in prepped["convs"]:
        operands += [c["w1"], c["b1"], c["w2"], c["b2"],
                     c["bn_scale"], c["bn_shift"]]
    operands += [s, prepped["wihq"], prepped["wihr"], prepped["whh"],
                 prepped["bih"], prepped["bhh"],
                 prepped["fc1_wq"], prepped["fc1_wr"], prepped["fc1_b"],
                 prepped["fc2_w"], prepped["fc2_b"],
                 prepped["fc3_w"], prepped["fc3_b"]]

    kernel = _make_fused_kernel(num_layers, process_step, hidden)
    return pl.pallas_call(
        kernel,
        out_shape=jax.ShapeDtypeStruct((num_graphs, num_classes), jnp.float32),
        in_specs=[_SMEM] + [_VMEM] * (len(operands) - 1),
        out_specs=_VMEM,
        compiler_params=pltpu.CompilerParams(vmem_limit_bytes=32 * 1024 * 1024),
    )(*operands)


# ----------------------------- parameter init --------------------------------

def init_params(key, num_classes, gnn_layers, embed_dim, hidden_dim):
    keys = list(jax.random.split(key, 64))
    ki = iter(keys)

    def linear(in_dim, out_dim):
        bound = 1.0 / (in_dim ** 0.5)
        w = jax.random.uniform(next(ki), (in_dim, out_dim), jnp.float32, -bound, bound)
        b = jax.random.uniform(next(ki), (1, out_dim), jnp.float32, -bound, bound)
        return w, b

    params = {"embedding": jax.random.normal(next(ki), (6, embed_dim), jnp.float32)}

    convs = []
    for i in range(gnn_layers):
        in_dim = 2 * embed_dim + 2 if i == 0 else hidden_dim
        w1, b1 = linear(in_dim, hidden_dim)
        w2, b2 = linear(hidden_dim, hidden_dim)
        convs.append(dict(
            w1=w1, b1=b1, w2=w2, b2=b2,
            gamma=jnp.ones((1, hidden_dim), jnp.float32),
            beta=jnp.zeros((1, hidden_dim), jnp.float32),
            mean=jnp.zeros((1, hidden_dim), jnp.float32),
            var=jnp.ones((1, hidden_dim), jnp.float32),
            eps=0.0))
    params["convs"] = convs

    bound = 1.0 / (hidden_dim ** 0.5)
    params["s2s"] = dict(
        W_ih=jax.random.uniform(next(ki), (4 * hidden_dim, 2 * hidden_dim), jnp.float32, -bound, bound),
        W_hh=jax.random.uniform(next(ki), (4 * hidden_dim, hidden_dim), jnp.float32, -bound, bound),
        b_ih=jax.random.uniform(next(ki), (4 * hidden_dim,), jnp.float32, -bound, bound),
        b_hh=jax.random.uniform(next(ki), (4 * hidden_dim,), jnp.float32, -bound, bound))

    params["fc1_w"], params["fc1_b"] = linear(2 * hidden_dim, hidden_dim)
    params["fc2_w"], params["fc2_b"] = linear(hidden_dim, hidden_dim // 2)
    params["fc3_w"], params["fc3_b"] = linear(hidden_dim // 2, num_classes)
    return params


def prep_params(params, hidden_dim):
    """Fold eval-BN to (scale, shift), pre-cast GIN matmul weights to bf16,
    pre-transpose/split LSTM and fc1 weights so the kernel never concatenates."""
    H = hidden_dim
    prepped = {
        "embedding": params["embedding"],
        "eps": jnp.array([c["eps"] for c in params["convs"]], jnp.float32),
    }
    convs = []
    for c in params["convs"]:
        scale = c["gamma"] * jax.lax.rsqrt(c["var"] + 1e-5)   # (1, H)
        shift = c["beta"] - c["mean"] * scale
        convs.append(dict(
            w1=c["w1"].astype(jnp.bfloat16), b1=c["b1"],
            w2=c["w2"].astype(jnp.bfloat16), b2=c["b2"],
            bn_scale=scale, bn_shift=shift))
    prepped["convs"] = convs

    s2s = params["s2s"]
    wih_t = s2s["W_ih"].T                      # (2H, 4H)
    prepped["wihq"] = wih_t[:H]                # multiplies q   half of q_star
    prepped["wihr"] = wih_t[H:]                # multiplies r   half of q_star
    prepped["whh"] = s2s["W_hh"].T             # (H, 4H)
    prepped["bih"] = s2s["b_ih"].reshape(1, -1)
    prepped["bhh"] = s2s["b_hh"].reshape(1, -1)

    prepped["fc1_wq"] = params["fc1_w"][:H]
    prepped["fc1_wr"] = params["fc1_w"][H:]
    prepped["fc1_b"] = params["fc1_b"]
    prepped["fc2_w"] = params["fc2_w"]
    prepped["fc2_b"] = params["fc2_b"]
    prepped["fc3_w"] = params["fc3_w"]
    prepped["fc3_b"] = params["fc3_b"]
    return prepped


# --------------------------------- main ---------------------------------------

if __name__ == "__main__":
    num_classes = 3
    gnn_layers = 3
    embed_dim = 8
    hidden_dim = 32
    process_step = 3

    key = jax.random.PRNGKey(0)
    k_param, k_codes, k_feat = jax.random.split(key, 3)
    params = init_params(k_param, num_classes, gnn_layers, embed_dim, hidden_dim)
    prepped = prep_params(params, hidden_dim)

    # two graphs of 8 nodes each (N=16), node features: 2 int codes + 2 floats
    N = 16
    codes = jax.random.randint(k_codes, (N, 2), 0, 6).astype(jnp.float32)
    feats = jax.random.normal(k_feat, (N, 2), jnp.float32)
    x = jnp.concatenate([codes, feats], axis=1)                      # (16, 4)

    # bidirectional ring inside each 8-node graph -> 32 directed edges
    src_list, dst_list = [], []
    for g in range(2):
        off = 8 * g
        for i in range(8):
            a, b = off + i, off + (i + 1) % 8
            src_list += [a, b]
            dst_list += [b, a]
    edge_index = jnp.array([src_list, dst_list], dtype=jnp.int32)    # (2, 32)
    batch = jnp.array([0] * 8 + [1] * 8, dtype=jnp.int32)            # (16,)

    logits = net_forward(prepped, x, edge_index, batch,
                         num_graphs=2, process_step=process_step)
    jax.block_until_ready(logits)
    assert logits.shape == (2, num_classes)
    assert bool(jnp.all(jnp.isfinite(logits)))
    print("KERNEL_OK")
</pallas_src>

<mosaic_0001>
module attributes {stable_mosaic.version = 11 : i64} {
  func.func @kernel(%arg0: memref<3xf32, #tpu.memory_space<smem>>, %arg1: memref<16x16xbf16, #tpu.memory_space<vmem>>, %arg2: memref<16x18xf32, #tpu.memory_space<vmem>>, %arg3: memref<18x32xbf16, #tpu.memory_space<vmem>>, %arg4: memref<1x32xf32, #tpu.memory_space<vmem>>, %arg5: memref<32x32xbf16, #tpu.memory_space<vmem>>, %arg6: memref<1x32xf32, #tpu.memory_space<vmem>>, %arg7: memref<1x32xf32, #tpu.memory_space<vmem>>, %arg8: memref<1x32xf32, #tpu.memory_space<vmem>>, %arg9: memref<32x32xbf16, #tpu.memory_space<vmem>>, %arg10: memref<1x32xf32, #tpu.memory_space<vmem>>, %arg11: memref<32x32xbf16, #tpu.memory_space<vmem>>, %arg12: memref<1x32xf32, #tpu.memory_space<vmem>>, %arg13: memref<1x32xf32, #tpu.memory_space<vmem>>, %arg14: memref<1x32xf32, #tpu.memory_space<vmem>>, %arg15: memref<32x32xbf16, #tpu.memory_space<vmem>>, %arg16: memref<1x32xf32, #tpu.memory_space<vmem>>, %arg17: memref<32x32xbf16, #tpu.memory_space<vmem>>, %arg18: memref<1x32xf32, #tpu.memory_space<vmem>>, %arg19: memref<1x32xf32, #tpu.memory_space<vmem>>, %arg20: memref<1x32xf32, #tpu.memory_space<vmem>>, %arg21: memref<2x16xf32, #tpu.memory_space<vmem>>, %arg22: memref<32x128xf32, #tpu.memory_space<vmem>>, %arg23: memref<32x128xf32, #tpu.memory_space<vmem>>, %arg24: memref<32x128xf32, #tpu.memory_space<vmem>>, %arg25: memref<1x128xf32, #tpu.memory_space<vmem>>, %arg26: memref<1x128xf32, #tpu.memory_space<vmem>>, %arg27: memref<32x32xf32, #tpu.memory_space<vmem>>, %arg28: memref<32x32xf32, #tpu.memory_space<vmem>>, %arg29: memref<1x32xf32, #tpu.memory_space<vmem>>, %arg30: memref<32x16xf32, #tpu.memory_space<vmem>>, %arg31: memref<1x16xf32, #tpu.memory_space<vmem>>, %arg32: memref<16x3xf32, #tpu.memory_space<vmem>>, %arg33: memref<1x3xf32, #tpu.memory_space<vmem>>, %arg34: memref<2x3xf32, #tpu.memory_space<vmem>>) attributes {dimension_semantics = [], scalar_prefetch = 0 : i64, scratch_operands = 0 : i64, tpu.core_type = #tpu.core_type<tc>} {
    %c0 = arith.constant 0 : index
    %c0_0 = arith.constant 0 : index
    %0 = vector.load %arg1[%c0, %c0_0] : memref<16x16xbf16, #tpu.memory_space<vmem>>, vector<16x16xbf16>
    %c0_1 = arith.constant 0 : index
    %c0_2 = arith.constant 0 : index
    %1 = vector.load %arg2[%c0_1, %c0_2] : memref<16x18xf32, #tpu.memory_space<vmem>>, vector<16x18xf32>
    %c0_3 = arith.constant 0 : index
    %2 = memref.load %arg0[%c0_3] : memref<3xf32, #tpu.memory_space<smem>>
    %3 = arith.truncf %1 : vector<16x18xf32> to vector<16x18xbf16>
    %cst = arith.constant dense<0.000000e+00> : vector<16x18xf32>
    %4 = tpu.matmul %0, %3, %cst {dimension_numbers = #tpu.dot_dimension_numbers<[1], [0], [0], [1], [0, 0, 1, 1], [], []>} : vector<16x16xbf16>, vector<16x18xbf16>, vector<16x18xf32> -> vector<16x18xf32>
    %cst_4 = arith.constant 1.000000e+00 : f32
    %5 = arith.addf %cst_4, %2 : f32
    %6 = vector.broadcast %5 : f32 to vector<16x18xf32>
    %7 = arith.mulf %6, %1 : vector<16x18xf32>
    %8 = arith.addf %7, %4 : vector<16x18xf32>
    %9 = arith.truncf %8 : vector<16x18xf32> to vector<16x18xbf16>
    %c0_5 = arith.constant 0 : index
    %c0_6 = arith.constant 0 : index
    %10 = vector.load %arg3[%c0_5, %c0_6] : memref<18x32xbf16, #tpu.memory_space<vmem>>, vector<18x32xbf16>
    %cst_7 = arith.constant dense<0.000000e+00> : vector<16x32xf32>
    %11 = tpu.matmul %9, %10, %cst_7 {dimension_numbers = #tpu.dot_dimension_numbers<[1], [0], [0], [1], [0, 0, 1, 1], [], []>} : vector<16x18xbf16>, vector<18x32xbf16>, vector<16x32xf32> -> vector<16x32xf32>
    %c0_8 = arith.constant 0 : index
    %c0_9 = arith.constant 0 : index
    %12 = vector.load %arg4[%c0_8, %c0_9] : memref<1x32xf32, #tpu.memory_space<vmem>>, vector<1x32xf32>
    %13 = vector.broadcast %12 : vector<1x32xf32> to vector<16x32xf32>
    %14 = arith.addf %11, %13 : vector<16x32xf32>
    %cst_10 = arith.constant 0.000000e+00 : f32
    %15 = vector.broadcast %cst_10 : f32 to vector<16x32xf32>
    %16 = arith.maximumf %14, %15 : vector<16x32xf32>
    %17 = arith.truncf %16 : vector<16x32xf32> to vector<16x32xbf16>
    %c0_11 = arith.constant 0 : index
    %c0_12 = arith.constant 0 : index
    %18 = vector.load %arg5[%c0_11, %c0_12] : memref<32x32xbf16, #tpu.memory_space<vmem>>, vector<32x32xbf16>
    %cst_13 = arith.constant dense<0.000000e+00> : vector<16x32xf32>
    %19 = tpu.matmul %17, %18, %cst_13 {dimension_numbers = #tpu.dot_dimension_numbers<[1], [0], [0], [1], [0, 0, 1, 1], [], []>} : vector<16x32xbf16>, vector<32x32xbf16>, vector<16x32xf32> -> vector<16x32xf32>
    %c0_14 = arith.constant 0 : index
    %c0_15 = arith.constant 0 : index
    %20 = vector.load %arg6[%c0_14, %c0_15] : memref<1x32xf32, #tpu.memory_space<vmem>>, vector<1x32xf32>
    %21 = vector.broadcast %20 : vector<1x32xf32> to vector<16x32xf32>
    %22 = arith.addf %19, %21 : vector<16x32xf32>
    %cst_16 = arith.constant 0.000000e+00 : f32
    %23 = vector.broadcast %cst_16 : f32 to vector<16x32xf32>
    %24 = arith.maximumf %22, %23 : vector<16x32xf32>
    %c0_17 = arith.constant 0 : index
    %c0_18 = arith.constant 0 : index
    %25 = vector.load %arg7[%c0_17, %c0_18] : memref<1x32xf32, #tpu.memory_space<vmem>>, vector<1x32xf32>
    %26 = vector.broadcast %25 : vector<1x32xf32> to vector<16x32xf32>
    %27 = arith.mulf %24, %26 : vector<16x32xf32>
    %c0_19 = arith.constant 0 : index
    %c0_20 = arith.constant 0 : index
    %28 = vector.load %arg8[%c0_19, %c0_20] : memref<1x32xf32, #tpu.memory_space<vmem>>, vector<1x32xf32>
    %29 = vector.broadcast %28 : vector<1x32xf32> to vector<16x32xf32>
    %30 = arith.addf %27, %29 : vector<16x32xf32>
    %c1 = arith.constant 1 : index
    %31 = memref.load %arg0[%c1] : memref<3xf32, #tpu.memory_space<smem>>
    %32 = arith.truncf %30 : vector<16x32xf32> to vector<16x32xbf16>
    %cst_21 = arith.constant dense<0.000000e+00> : vector<16x32xf32>
    %33 = tpu.matmul %0, %32, %cst_21 {dimension_numbers = #tpu.dot_dimension_numbers<[1], [0], [0], [1], [0, 0, 1, 1], [], []>} : vector<16x16xbf16>, vector<16x32xbf16>, vector<16x32xf32> -> vector<16x32xf32>
    %cst_22 = arith.constant 1.000000e+00 : f32
    %34 = arith.addf %cst_22, %31 : f32
    %35 = vector.broadcast %34 : f32 to vector<16x32xf32>
    %36 = arith.mulf %35, %30 : vector<16x32xf32>
    %37 = arith.addf %36, %33 : vector<16x32xf32>
    %38 = arith.truncf %37 : vector<16x32xf32> to vector<16x32xbf16>
    %c0_23 = arith.constant 0 : index
    %c0_24 = arith.constant 0 : index
    %39 = vector.load %arg9[%c0_23, %c0_24] : memref<32x32xbf16, #tpu.memory_space<vmem>>, vector<32x32xbf16>
    %cst_25 = arith.constant dense<0.000000e+00> : vector<16x32xf32>
    %40 = tpu.matmul %38, %39, %cst_25 {dimension_numbers = #tpu.dot_dimension_numbers<[1], [0], [0], [1], [0, 0, 1, 1], [], []>} : vector<16x32xbf16>, vector<32x32xbf16>, vector<16x32xf32> -> vector<16x32xf32>
    %c0_26 = arith.constant 0 : index
    %c0_27 = arith.constant 0 : index
    %41 = vector.load %arg10[%c0_26, %c0_27] : memref<1x32xf32, #tpu.memory_space<vmem>>, vector<1x32xf32>
    %42 = vector.broadcast %41 : vector<1x32xf32> to vector<16x32xf32>
    %43 = arith.addf %40, %42 : vector<16x32xf32>
    %cst_28 = arith.constant 0.000000e+00 : f32
    %44 = vector.broadcast %cst_28 : f32 to vector<16x32xf32>
    %45 = arith.maximumf %43, %44 : vector<16x32xf32>
    %46 = arith.truncf %45 : vector<16x32xf32> to vector<16x32xbf16>
    %c0_29 = arith.constant 0 : index
    %c0_30 = arith.constant 0 : index
    %47 = vector.load %arg11[%c0_29, %c0_30] : memref<32x32xbf16, #tpu.memory_space<vmem>>, vector<32x32xbf16>
    %cst_31 = arith.constant dense<0.000000e+00> : vector<16x32xf32>
    %48 = tpu.matmul %46, %47, %cst_31 {dimension_numbers = #tpu.dot_dimension_numbers<[1], [0], [0], [1], [0, 0, 1, 1], [], []>} : vector<16x32xbf16>, vector<32x32xbf16>, vector<16x32xf32> -> vector<16x32xf32>
    %c0_32 = arith.constant 0 : index
    %c0_33 = arith.constant 0 : index
    %49 = vector.load %arg12[%c0_32, %c0_33] : memref<1x32xf32, #tpu.memory_space<vmem>>, vector<1x32xf32>
    %50 = vector.broadcast %49 : vector<1x32xf32> to vector<16x32xf32>
    %51 = arith.addf %48, %50 : vector<16x32xf32>
    %cst_34 = arith.constant 0.000000e+00 : f32
    %52 = vector.broadcast %cst_34 : f32 to vector<16x32xf32>
    %53 = arith.maximumf %51, %52 : vector<16x32xf32>
    %c0_35 = arith.constant 0 : index
    %c0_36 = arith.constant 0 : index
    %54 = vector.load %arg13[%c0_35, %c0_36] : memref<1x32xf32, #tpu.memory_space<vmem>>, vector<1x32xf32>
    %55 = vector.broadcast %54 : vector<1x32xf32> to vector<16x32xf32>
    %56 = arith.mulf %53, %55 : vector<16x32xf32>
    %c0_37 = arith.constant 0 : index
    %c0_38 = arith.constant 0 : index
    %57 = vector.load %arg14[%c0_37, %c0_38] : memref<1x32xf32, #tpu.memory_space<vmem>>, vector<1x32xf32>
    %58 = vector.broadcast %57 : vector<1x32xf32> to vector<16x32xf32>
    %59 = arith.addf %56, %58 : vector<16x32xf32>
    %60 = arith.maximumf %30, %59 : vector<16x32xf32>
    %c2 = arith.constant 2 : index
    %61 = memref.load %arg0[%c2] : memref<3xf32, #tpu.memory_space<smem>>
    %62 = arith.truncf %59 : vector<16x32xf32> to vector<16x32xbf16>
    %cst_39 = arith.constant dense<0.000000e+00> : vector<16x32xf32>
    %63 = tpu.matmul %0, %62, %cst_39 {dimension_numbers = #tpu.dot_dimension_numbers<[1], [0], [0], [1], [0, 0, 1, 1], [], []>} : vector<16x16xbf16>, vector<16x32xbf16>, vector<16x32xf32> -> vector<16x32xf32>
    %cst_40 = arith.constant 1.000000e+00 : f32
    %64 = arith.addf %cst_40, %61 : f32
    %65 = vector.broadcast %64 : f32 to vector<16x32xf32>
    %66 = arith.mulf %65, %59 : vector<16x32xf32>
    %67 = arith.addf %66, %63 : vector<16x32xf32>
    %68 = arith.truncf %67 : vector<16x32xf32> to vector<16x32xbf16>
    %c0_41 = arith.constant 0 : index
    %c0_42 = arith.constant 0 : index
    %69 = vector.load %arg15[%c0_41, %c0_42] : memref<32x32xbf16, #tpu.memory_space<vmem>>, vector<32x32xbf16>
    %cst_43 = arith.constant dense<0.000000e+00> : vector<16x32xf32>
    %70 = tpu.matmul %68, %69, %cst_43 {dimension_numbers = #tpu.dot_dimension_numbers<[1], [0], [0], [1], [0, 0, 1, 1], [], []>} : vector<16x32xbf16>, vector<32x32xbf16>, vector<16x32xf32> -> vector<16x32xf32>
    %c0_44 = arith.constant 0 : index
    %c0_45 = arith.constant 0 : index
    %71 = vector.load %arg16[%c0_44, %c0_45] : memref<1x32xf32, #tpu.memory_space<vmem>>, vector<1x32xf32>
    %72 = vector.broadcast %71 : vector<1x32xf32> to vector<16x32xf32>
    %73 = arith.addf %70, %72 : vector<16x32xf32>
    %cst_46 = arith.constant 0.000000e+00 : f32
    %74 = vector.broadcast %cst_46 : f32 to vector<16x32xf32>
    %75 = arith.maximumf %73, %74 : vector<16x32xf32>
    %76 = arith.truncf %75 : vector<16x32xf32> to vector<16x32xbf16>
    %c0_47 = arith.constant 0 : index
    %c0_48 = arith.constant 0 : index
    %77 = vector.load %arg17[%c0_47, %c0_48] : memref<32x32xbf16, #tpu.memory_space<vmem>>, vector<32x32xbf16>
    %cst_49 = arith.constant dense<0.000000e+00> : vector<16x32xf32>
    %78 = tpu.matmul %76, %77, %cst_49 {dimension_numbers = #tpu.dot_dimension_numbers<[1], [0], [0], [1], [0, 0, 1, 1], [], []>} : vector<16x32xbf16>, vector<32x32xbf16>, vector<16x32xf32> -> vector<16x32xf32>
    %c0_50 = arith.constant 0 : index
    %c0_51 = arith.constant 0 : index
    %79 = vector.load %arg18[%c0_50, %c0_51] : memref<1x32xf32, #tpu.memory_space<vmem>>, vector<1x32xf32>
    %80 = vector.broadcast %79 : vector<1x32xf32> to vector<16x32xf32>
    %81 = arith.addf %78, %80 : vector<16x32xf32>
    %cst_52 = arith.constant 0.000000e+00 : f32
    %82 = vector.broadcast %cst_52 : f32 to vector<16x32xf32>
    %83 = arith.maximumf %81, %82 : vector<16x32xf32>
    %c0_53 = arith.constant 0 : index
    %c0_54 = arith.constant 0 : index
    %84 = vector.load %arg19[%c0_53, %c0_54] : memref<1x32xf32, #tpu.memory_space<vmem>>, vector<1x32xf32>
    %85 = vector.broadcast %84 : vector<1x32xf32> to vector<16x32xf32>
    %86 = arith.mulf %83, %85 : vector<16x32xf32>
    %c0_55 = arith.constant 0 : index
    %c0_56 = arith.constant 0 : index
    %87 = vector.load %arg20[%c0_55, %c0_56] : memref<1x32xf32, #tpu.memory_space<vmem>>, vector<1x32xf32>
    %88 = vector.broadcast %87 : vector<1x32xf32> to vector<16x32xf32>
    %89 = arith.addf %86, %88 : vector<16x32xf32>
    %90 = arith.maximumf %60, %89 : vector<16x32xf32>
    %91 = tpu.transpose %90, [1, 0] : vector<16x32xf32> -> vector<32x16xf32>
    %c0_57 = arith.constant 0 : index
    %c0_58 = arith.constant 0 : index
    %92 = vector.load %arg21[%c0_57, %c0_58] : memref<2x16xf32, #tpu.memory_space<vmem>>, vector<2x16xf32>
    %cst_59 = arith.constant 0.000000e+00 : f32
    %93 = vector.broadcast %cst_59 : f32 to vector<2x32xf32>
    %cst_60 = arith.constant 0.000000e+00 : f32
    %94 = vector.broadcast %cst_60 : f32 to vector<2x32xf32>
    %cst_61 = arith.constant 0.000000e+00 : f32
    %95 = vector.broadcast %cst_61 : f32 to vector<2x32xf32>
    %cst_62 = arith.constant 0.000000e+00 : f32
    %96 = vector.broadcast %cst_62 : f32 to vector<2x32xf32>
    %c0_63 = arith.constant 0 : index
    %c0_64 = arith.constant 0 : index
    %97 = vector.load %arg22[%c0_63, %c0_64] : memref<32x128xf32, #tpu.memory_space<vmem>>, vector<32x128xf32>
    %c0_65 = arith.constant 0 : index
    %c0_66 = arith.constant 0 : index
    %98 = vector.load %arg23[%c0_65, %c0_66] : memref<32x128xf32, #tpu.memory_space<vmem>>, vector<32x128xf32>
    %c0_67 = arith.constant 0 : index
    %c0_68 = arith.constant 0 : index
    %99 = vector.load %arg24[%c0_67, %c0_68] : memref<32x128xf32, #tpu.memory_space<vmem>>, vector<32x128xf32>
    %c0_69 = arith.constant 0 : index
    %c0_70 = arith.constant 0 : index
    %100 = vector.load %arg25[%c0_69, %c0_70] : memref<1x128xf32, #tpu.memory_space<vmem>>, vector<1x128xf32>
    %c0_71 = arith.constant 0 : index
    %c0_72 = arith.constant 0 : index
    %101 = vector.load %arg26[%c0_71, %c0_72] : memref<1x128xf32, #tpu.memory_space<vmem>>, vector<1x128xf32>
    %102 = arith.addf %100, %101 : vector<1x128xf32>
    %cst_73 = arith.constant dense<0.000000e+00> : vector<2x128xf32>
    %103 = tpu.matmul %95, %97, %cst_73 {dimension_numbers = #tpu.dot_dimension_numbers<[1], [0], [0], [1], [0, 0, 1, 1], [], []>} : vector<2x32xf32>, vector<32x128xf32>, vector<2x128xf32> -> vector<2x128xf32>
    %cst_74 = arith.constant dense<0.000000e+00> : vector<2x128xf32>
    %104 = tpu.matmul %96, %98, %cst_74 {dimension_numbers = #tpu.dot_dimension_numbers<[1], [0], [0], [1], [0, 0, 1, 1], [], []>} : vector<2x32xf32>, vector<32x128xf32>, vector<2x128xf32> -> vector<2x128xf32>
    %105 = arith.addf %103, %104 : vector<2x128xf32>
    %cst_75 = arith.constant dense<0.000000e+00> : vector<2x128xf32>
    %106 = tpu.matmul %93, %99, %cst_75 {dimension_numbers = #tpu.dot_dimension_numbers<[1], [0], [0], [1], [0, 0, 1, 1], [], []>} : vector<2x32xf32>, vector<32x128xf32>, vector<2x128xf32> -> vector<2x128xf32>
    %107 = arith.addf %105, %106 : vector<2x128xf32>
    %108 = vector.broadcast %102 : vector<1x128xf32> to vector<2x128xf32>
    %109 = arith.addf %107, %108 : vector<2x128xf32>
    %110 = vector.extract_strided_slice %109 {offsets = [0, 0], sizes = [2, 32], strides = [1, 1]} : vector<2x128xf32> to vector<2x32xf32>
    %cst_76 = arith.constant 0.000000e+00 : f32
    %111 = vector.broadcast %cst_76 : f32 to vector<2x32xf32>
    %112 = arith.subf %111, %110 : vector<2x32xf32>
    %113 = math.exp %112 : vector<2x32xf32>
    %cst_77 = arith.constant 1.000000e+00 : f32
    %114 = vector.broadcast %cst_77 : f32 to vector<2x32xf32>
    %115 = arith.addf %114, %113 : vector<2x32xf32>
    %cst_78 = arith.constant 1.000000e+00 : f32
    %116 = vector.broadcast %cst_78 : f32 to vector<2x32xf32>
    %117 = arith.divf %116, %115 : vector<2x32xf32>
    %118 = vector.extract_strided_slice %109 {offsets = [0, 32], sizes = [2, 32], strides = [1, 1]} : vector<2x128xf32> to vector<2x32xf32>
    %cst_79 = arith.constant 0.000000e+00 : f32
    %119 = vector.broadcast %cst_79 : f32 to vector<2x32xf32>
    %120 = arith.subf %119, %118 : vector<2x32xf32>
    %121 = math.exp %120 : vector<2x32xf32>
    %cst_80 = arith.constant 1.000000e+00 : f32
    %122 = vector.broadcast %cst_80 : f32 to vector<2x32xf32>
    %123 = arith.addf %122, %121 : vector<2x32xf32>
    %cst_81 = arith.constant 1.000000e+00 : f32
    %124 = vector.broadcast %cst_81 : f32 to vector<2x32xf32>
    %125 = arith.divf %124, %123 : vector<2x32xf32>
    %126 = vector.extract_strided_slice %109 {offsets = [0, 64], sizes = [2, 32], strides = [1, 1]} : vector<2x128xf32> to vector<2x32xf32>
    %127 = math.tanh %126 : vector<2x32xf32>
    %128 = vector.extract_strided_slice %109 {offsets = [0, 96], sizes = [2, 32], strides = [1, 1]} : vector<2x128xf32> to vector<2x32xf32>
    %cst_82 = arith.constant 0.000000e+00 : f32
    %129 = vector.broadcast %cst_82 : f32 to vector<2x32xf32>
    %130 = arith.subf %129, %128 : vector<2x32xf32>
    %131 = math.exp %130 : vector<2x32xf32>
    %cst_83 = arith.constant 1.000000e+00 : f32
    %132 = vector.broadcast %cst_83 : f32 to vector<2x32xf32>
    %133 = arith.addf %132, %131 : vector<2x32xf32>
    %cst_84 = arith.constant 1.000000e+00 : f32
    %134 = vector.broadcast %cst_84 : f32 to vector<2x32xf32>
    %135 = arith.divf %134, %133 : vector<2x32xf32>
    %136 = arith.mulf %125, %94 : vector<2x32xf32>
    %137 = arith.mulf %117, %127 : vector<2x32xf32>
    %138 = arith.addf %136, %137 : vector<2x32xf32>
    %139 = math.tanh %138 : vector<2x32xf32>
    %140 = arith.mulf %135, %139 : vector<2x32xf32>
    %cst_85 = arith.constant dense<0.000000e+00> : vector<2x16xf32>
    %141 = tpu.matmul %140, %91, %cst_85 {dimension_numbers = #tpu.dot_dimension_numbers<[1], [0], [0], [1], [0, 0, 1, 1], [], []>} : vector<2x32xf32>, vector<32x16xf32>, vector<2x16xf32> -> vector<2x16xf32>
    %cst_86 = arith.constant 5.000000e-01 : f32
    %142 = vector.broadcast %cst_86 : f32 to vector<2x16xf32>
    %143 = arith.cmpf ogt, %92, %142 : vector<2x16xf32>
    %cst_87 = arith.constant -1.000000e+30 : f32
    %144 = vector.broadcast %cst_87 : f32 to vector<2x16xf32>
    %145 = arith.select %143, %141, %144 : vector<2x16xi1>, vector<2x16xf32>
    %cst_88 = arith.constant dense<0xFF800000> : vector<2xf32>
    %146 = vector.multi_reduction <maximumf>, %145, %cst_88 [1] : vector<2x16xf32> to vector<2xf32>
    %147 = vector.shape_cast %146 : vector<2xf32> to vector<2x1xf32>
    %148 = vector.broadcast %147 : vector<2x1xf32> to vector<2x16xf32>
    %149 = arith.subf %145, %148 : vector<2x16xf32>
    %150 = math.exp %149 : vector<2x16xf32>
    %151 = arith.mulf %150, %92 : vector<2x16xf32>
    %cst_89 = arith.constant dense<0.000000e+00> : vector<2xf32>
    %152 = vector.multi_reduction <add>, %151, %cst_89 [1] : vector<2x16xf32> to vector<2xf32>
    %153 = vector.shape_cast %152 : vector<2xf32> to vector<2x1xf32>
    %154 = vector.broadcast %153 : vector<2x1xf32> to vector<2x16xf32>
    %155 = arith.divf %151, %154 : vector<2x16xf32>
    %cst_90 = arith.constant dense<0.000000e+00> : vector<2x32xf32>
    %156 = tpu.matmul %155, %90, %cst_90 {dimension_numbers = #tpu.dot_dimension_numbers<[1], [0], [0], [1], [0, 0, 1, 1], [], []>} : vector<2x16xf32>, vector<16x32xf32>, vector<2x32xf32> -> vector<2x32xf32>
    %cst_91 = arith.constant dense<0.000000e+00> : vector<2x128xf32>
    %157 = tpu.matmul %140, %97, %cst_91 {dimension_numbers = #tpu.dot_dimension_numbers<[1], [0], [0], [1], [0, 0, 1, 1], [], []>} : vector<2x32xf32>, vector<32x128xf32>, vector<2x128xf32> -> vector<2x128xf32>
    %cst_92 = arith.constant dense<0.000000e+00> : vector<2x128xf32>
    %158 = tpu.matmul %156, %98, %cst_92 {dimension_numbers = #tpu.dot_dimension_numbers<[1], [0], [0], [1], [0, 0, 1, 1], [], []>} : vector<2x32xf32>, vector<32x128xf32>, vector<2x128xf32> -> vector<2x128xf32>
    %159 = arith.addf %157, %158 : vector<2x128xf32>
    %cst_93 = arith.constant dense<0.000000e+00> : vector<2x128xf32>
    %160 = tpu.matmul %140, %99, %cst_93 {dimension_numbers = #tpu.dot_dimension_numbers<[1], [0], [0], [1], [0, 0, 1, 1], [], []>} : vector<2x32xf32>, vector<32x128xf32>, vector<2x128xf32> -> vector<2x128xf32>
    %161 = arith.addf %159, %160 : vector<2x128xf32>
    %162 = vector.broadcast %102 : vector<1x128xf32> to vector<2x128xf32>
    %163 = arith.addf %161, %162 : vector<2x128xf32>
    %164 = vector.extract_strided_slice %163 {offsets = [0, 0], sizes = [2, 32], strides = [1, 1]} : vector<2x128xf32> to vector<2x32xf32>
    %cst_94 = arith.constant 0.000000e+00 : f32
    %165 = vector.broadcast %cst_94 : f32 to vector<2x32xf32>
    %166 = arith.subf %165, %164 : vector<2x32xf32>
    %167 = math.exp %166 : vector<2x32xf32>
    %cst_95 = arith.constant 1.000000e+00 : f32
    %168 = vector.broadcast %cst_95 : f32 to vector<2x32xf32>
    %169 = arith.addf %168, %167 : vector<2x32xf32>
    %cst_96 = arith.constant 1.000000e+00 : f32
    %170 = vector.broadcast %cst_96 : f32 to vector<2x32xf32>
    %171 = arith.divf %170, %169 : vector<2x32xf32>
    %172 = vector.extract_strided_slice %163 {offsets = [0, 32], sizes = [2, 32], strides = [1, 1]} : vector<2x128xf32> to vector<2x32xf32>
    %cst_97 = arith.constant 0.000000e+00 : f32
    %173 = vector.broadcast %cst_97 : f32 to vector<2x32xf32>
    %174 = arith.subf %173, %172 : vector<2x32xf32>
    %175 = math.exp %174 : vector<2x32xf32>
    %cst_98 = arith.constant 1.000000e+00 : f32
    %176 = vector.broadcast %cst_98 : f32 to vector<2x32xf32>
    %177 = arith.addf %176, %175 : vector<2x32xf32>
    %cst_99 = arith.constant 1.000000e+00 : f32
    %178 = vector.broadcast %cst_99 : f32 to vector<2x32xf32>
    %179 = arith.divf %178, %177 : vector<2x32xf32>
    %180 = vector.extract_strided_slice %163 {offsets = [0, 64], sizes = [2, 32], strides = [1, 1]} : vector<2x128xf32> to vector<2x32xf32>
    %181 = math.tanh %180 : vector<2x32xf32>
    %182 = vector.extract_strided_slice %163 {offsets = [0, 96], sizes = [2, 32], strides = [1, 1]} : vector<2x128xf32> to vector<2x32xf32>
    %cst_100 = arith.constant 0.000000e+00 : f32
    %183 = vector.broadcast %cst_100 : f32 to vector<2x32xf32>
    %184 = arith.subf %183, %182 : vector<2x32xf32>
    %185 = math.exp %184 : vector<2x32xf32>
    %cst_101 = arith.constant 1.000000e+00 : f32
    %186 = vector.broadcast %cst_101 : f32 to vector<2x32xf32>
    %187 = arith.addf %186, %185 : vector<2x32xf32>
    %cst_102 = arith.constant 1.000000e+00 : f32
    %188 = vector.broadcast %cst_102 : f32 to vector<2x32xf32>
    %189 = arith.divf %188, %187 : vector<2x32xf32>
    %190 = arith.mulf %179, %138 : vector<2x32xf32>
    %191 = arith.mulf %171, %181 : vector<2x32xf32>
    %192 = arith.addf %190, %191 : vector<2x32xf32>
    %193 = math.tanh %192 : vector<2x32xf32>
    %194 = arith.mulf %189, %193 : vector<2x32xf32>
    %cst_103 = arith.constant dense<0.000000e+00> : vector<2x16xf32>
    %195 = tpu.matmul %194, %91, %cst_103 {dimension_numbers = #tpu.dot_dimension_numbers<[1], [0], [0], [1], [0, 0, 1, 1], [], []>} : vector<2x32xf32>, vector<32x16xf32>, vector<2x16xf32> -> vector<2x16xf32>
    %cst_104 = arith.constant 5.000000e-01 : f32
    %196 = vector.broadcast %cst_104 : f32 to vector<2x16xf32>
    %197 = arith.cmpf ogt, %92, %196 : vector<2x16xf32>
    %cst_105 = arith.constant -1.000000e+30 : f32
    %198 = vector.broadcast %cst_105 : f32 to vector<2x16xf32>
    %199 = arith.select %197, %195, %198 : vector<2x16xi1>, vector<2x16xf32>
    %cst_106 = arith.constant dense<0xFF800000> : vector<2xf32>
    %200 = vector.multi_reduction <maximumf>, %199, %cst_106 [1] : vector<2x16xf32> to vector<2xf32>
    %201 = vector.shape_cast %200 : vector<2xf32> to vector<2x1xf32>
    %202 = vector.broadcast %201 : vector<2x1xf32> to vector<2x16xf32>
    %203 = arith.subf %199, %202 : vector<2x16xf32>
    %204 = math.exp %203 : vector<2x16xf32>
    %205 = arith.mulf %204, %92 : vector<2x16xf32>
    %cst_107 = arith.constant dense<0.000000e+00> : vector<2xf32>
    %206 = vector.multi_reduction <add>, %205, %cst_107 [1] : vector<2x16xf32> to vector<2xf32>
    %207 = vector.shape_cast %206 : vector<2xf32> to vector<2x1xf32>
    %208 = vector.broadcast %207 : vector<2x1xf32> to vector<2x16xf32>
    %209 = arith.divf %205, %208 : vector<2x16xf32>
    %cst_108 = arith.constant dense<0.000000e+00> : vector<2x32xf32>
    %210 = tpu.matmul %209, %90, %cst_108 {dimension_numbers = #tpu.dot_dimension_numbers<[1], [0], [0], [1], [0, 0, 1, 1], [], []>} : vector<2x16xf32>, vector<16x32xf32>, vector<2x32xf32> -> vector<2x32xf32>
    %cst_109 = arith.constant dense<0.000000e+00> : vector<2x128xf32>
    %211 = tpu.matmul %194, %97, %cst_109 {dimension_numbers = #tpu.dot_dimension_numbers<[1], [0], [0], [1], [0, 0, 1, 1], [], []>} : vector<2x32xf32>, vector<32x128xf32>, vector<2x128xf32> -> vector<2x128xf32>
    %cst_110 = arith.constant dense<0.000000e+00> : vector<2x128xf32>
    %212 = tpu.matmul %210, %98, %cst_110 {dimension_numbers = #tpu.dot_dimension_numbers<[1], [0], [0], [1], [0, 0, 1, 1], [], []>} : vector<2x32xf32>, vector<32x128xf32>, vector<2x128xf32> -> vector<2x128xf32>
    %213 = arith.addf %211, %212 : vector<2x128xf32>
    %cst_111 = arith.constant dense<0.000000e+00> : vector<2x128xf32>
    %214 = tpu.matmul %194, %99, %cst_111 {dimension_numbers = #tpu.dot_dimension_numbers<[1], [0], [0], [1], [0, 0, 1, 1], [], []>} : vector<2x32xf32>, vector<32x128xf32>, vector<2x128xf32> -> vector<2x128xf32>
    %215 = arith.addf %213, %214 : vector<2x128xf32>
    %216 = vector.broadcast %102 : vector<1x128xf32> to vector<2x128xf32>
    %217 = arith.addf %215, %216 : vector<2x128xf32>
    %218 = vector.extract_strided_slice %217 {offsets = [0, 0], sizes = [2, 32], strides = [1, 1]} : vector<2x128xf32> to vector<2x32xf32>
    %cst_112 = arith.constant 0.000000e+00 : f32
    %219 = vector.broadcast %cst_112 : f32 to vector<2x32xf32>
    %220 = arith.subf %219, %218 : vector<2x32xf32>
    %221 = math.exp %220 : vector<2x32xf32>
    %cst_113 = arith.constant 1.000000e+00 : f32
    %222 = vector.broadcast %cst_113 : f32 to vector<2x32xf32>
    %223 = arith.addf %222, %221 : vector<2x32xf32>
    %cst_114 = arith.constant 1.000000e+00 : f32
    %224 = vector.broadcast %cst_114 : f32 to vector<2x32xf32>
    %225 = arith.divf %224, %223 : vector<2x32xf32>
    %226 = vector.extract_strided_slice %217 {offsets = [0, 32], sizes = [2, 32], strides = [1, 1]} : vector<2x128xf32> to vector<2x32xf32>
    %cst_115 = arith.constant 0.000000e+00 : f32
    %227 = vector.broadcast %cst_115 : f32 to vector<2x32xf32>
    %228 = arith.subf %227, %226 : vector<2x32xf32>
    %229 = math.exp %228 : vector<2x32xf32>
    %cst_116 = arith.constant 1.000000e+00 : f32
    %230 = vector.broadcast %cst_116 : f32 to vector<2x32xf32>
    %231 = arith.addf %230, %229 : vector<2x32xf32>
    %cst_117 = arith.constant 1.000000e+00 : f32
    %232 = vector.broadcast %cst_117 : f32 to vector<2x32xf32>
    %233 = arith.divf %232, %231 : vector<2x32xf32>
    %234 = vector.extract_strided_slice %217 {offsets = [0, 64], sizes = [2, 32], strides = [1, 1]} : vector<2x128xf32> to vector<2x32xf32>
    %235 = math.tanh %234 : vector<2x32xf32>
    %236 = vector.extract_strided_slice %217 {offsets = [0, 96], sizes = [2, 32], strides = [1, 1]} : vector<2x128xf32> to vector<2x32xf32>
    %cst_118 = arith.constant 0.000000e+00 : f32
    %237 = vector.broadcast %cst_118 : f32 to vector<2x32xf32>
    %238 = arith.subf %237, %236 : vector<2x32xf32>
    %239 = math.exp %238 : vector<2x32xf32>
    %cst_119 = arith.constant 1.000000e+00 : f32
    %240 = vector.broadcast %cst_119 : f32 to vector<2x32xf32>
    %241 = arith.addf %240, %239 : vector<2x32xf32>
    %cst_120 = arith.constant 1.000000e+00 : f32
    %242 = vector.broadcast %cst_120 : f32 to vector<2x32xf32>
    %243 = arith.divf %242, %241 : vector<2x32xf32>
    %244 = arith.mulf %233, %192 : vector<2x32xf32>
    %245 = arith.mulf %225, %235 : vector<2x32xf32>
    %246 = arith.addf %244, %245 : vector<2x32xf32>
    %247 = math.tanh %246 : vector<2x32xf32>
    %248 = arith.mulf %243, %247 : vector<2x32xf32>
    %cst_121 = arith.constant dense<0.000000e+00> : vector<2x16xf32>
    %249 = tpu.matmul %248, %91, %cst_121 {dimension_numbers = #tpu.dot_dimension_numbers<[1], [0], [0], [1], [0, 0, 1, 1], [], []>} : vector<2x32xf32>, vector<32x16xf32>, vector<2x16xf32> -> vector<2x16xf32>
    %cst_122 = arith.constant 5.000000e-01 : f32
    %250 = vector.broadcast %cst_122 : f32 to vector<2x16xf32>
    %251 = arith.cmpf ogt, %92, %250 : vector<2x16xf32>
    %cst_123 = arith.constant -1.000000e+30 : f32
    %252 = vector.broadcast %cst_123 : f32 to vector<2x16xf32>
    %253 = arith.select %251, %249, %252 : vector<2x16xi1>, vector<2x16xf32>
    %cst_124 = arith.constant dense<0xFF800000> : vector<2xf32>
    %254 = vector.multi_reduction <maximumf>, %253, %cst_124 [1] : vector<2x16xf32> to vector<2xf32>
    %255 = vector.shape_cast %254 : vector<2xf32> to vector<2x1xf32>
    %256 = vector.broadcast %255 : vector<2x1xf32> to vector<2x16xf32>
    %257 = arith.subf %253, %256 : vector<2x16xf32>
    %258 = math.exp %257 : vector<2x16xf32>
    %259 = arith.mulf %258, %92 : vector<2x16xf32>
    %cst_125 = arith.constant dense<0.000000e+00> : vector<2xf32>
    %260 = vector.multi_reduction <add>, %259, %cst_125 [1] : vector<2x16xf32> to vector<2xf32>
    %261 = vector.shape_cast %260 : vector<2xf32> to vector<2x1xf32>
    %262 = vector.broadcast %261 : vector<2x1xf32> to vector<2x16xf32>
    %263 = arith.divf %259, %262 : vector<2x16xf32>
    %cst_126 = arith.constant dense<0.000000e+00> : vector<2x32xf32>
    %264 = tpu.matmul %263, %90, %cst_126 {dimension_numbers = #tpu.dot_dimension_numbers<[1], [0], [0], [1], [0, 0, 1, 1], [], []>} : vector<2x16xf32>, vector<16x32xf32>, vector<2x32xf32> -> vector<2x32xf32>
    %c0_127 = arith.constant 0 : index
    %c0_128 = arith.constant 0 : index
    %265 = vector.load %arg27[%c0_127, %c0_128] : memref<32x32xf32, #tpu.memory_space<vmem>>, vector<32x32xf32>
    %cst_129 = arith.constant dense<0.000000e+00> : vector<2x32xf32>
    %266 = tpu.matmul %248, %265, %cst_129 {dimension_numbers = #tpu.dot_dimension_numbers<[1], [0], [0], [1], [0, 0, 1, 1], [], []>} : vector<2x32xf32>, vector<32x32xf32>, vector<2x32xf32> -> vector<2x32xf32>
    %c0_130 = arith.constant 0 : index
    %c0_131 = arith.constant 0 : index
    %267 = vector.load %arg28[%c0_130, %c0_131] : memref<32x32xf32, #tpu.memory_space<vmem>>, vector<32x32xf32>
    %cst_132 = arith.constant dense<0.000000e+00> : vector<2x32xf32>
    %268 = tpu.matmul %264, %267, %cst_132 {dimension_numbers = #tpu.dot_dimension_numbers<[1], [0], [0], [1], [0, 0, 1, 1], [], []>} : vector<2x32xf32>, vector<32x32xf32>, vector<2x32xf32> -> vector<2x32xf32>
    %269 = arith.addf %266, %268 : vector<2x32xf32>
    %c0_133 = arith.constant 0 : index
    %c0_134 = arith.constant 0 : index
    %270 = vector.load %arg29[%c0_133, %c0_134] : memref<1x32xf32, #tpu.memory_space<vmem>>, vector<1x32xf32>
    %271 = vector.broadcast %270 : vector<1x32xf32> to vector<2x32xf32>
    %272 = arith.addf %269, %271 : vector<2x32xf32>
    %cst_135 = arith.constant 0.000000e+00 : f32
    %273 = vector.broadcast %cst_135 : f32 to vector<2x32xf32>
    %274 = arith.maximumf %272, %273 : vector<2x32xf32>
    %c0_136 = arith.constant 0 : index
    %c0_137 = arith.constant 0 : index
    %275 = vector.load %arg30[%c0_136, %c0_137] : memref<32x16xf32, #tpu.memory_space<vmem>>, vector<32x16xf32>
    %cst_138 = arith.constant dense<0.000000e+00> : vector<2x16xf32>
    %276 = tpu.matmul %274, %275, %cst_138 {dimension_numbers = #tpu.dot_dimension_numbers<[1], [0], [0], [1], [0, 0, 1, 1], [], []>} : vector<2x32xf32>, vector<32x16xf32>, vector<2x16xf32> -> vector<2x16xf32>
    %c0_139 = arith.constant 0 : index
    %c0_140 = arith.constant 0 : index
    %277 = vector.load %arg31[%c0_139, %c0_140] : memref<1x16xf32, #tpu.memory_space<vmem>>, vector<1x16xf32>
    %278 = vector.broadcast %277 : vector<1x16xf32> to vector<2x16xf32>
    %279 = arith.addf %276, %278 : vector<2x16xf32>
    %cst_141 = arith.constant 0.000000e+00 : f32
    %280 = vector.broadcast %cst_141 : f32 to vector<2x16xf32>
    %281 = arith.maximumf %279, %280 : vector<2x16xf32>
    %c0_142 = arith.constant 0 : index
    %c0_143 = arith.constant 0 : index
    %282 = vector.load %arg32[%c0_142, %c0_143] : memref<16x3xf32, #tpu.memory_space<vmem>>, vector<16x3xf32>
    %cst_144 = arith.constant dense<0.000000e+00> : vector<2x3xf32>
    %283 = tpu.matmul %281, %282, %cst_144 {dimension_numbers = #tpu.dot_dimension_numbers<[1], [0], [0], [1], [0, 0, 1, 1], [], []>} : vector<2x16xf32>, vector<16x3xf32>, vector<2x3xf32> -> vector<2x3xf32>
    %c0_145 = arith.constant 0 : index
    %c0_146 = arith.constant 0 : index
    %284 = vector.load %arg33[%c0_145, %c0_146] : memref<1x3xf32, #tpu.memory_space<vmem>>, vector<1x3xf32>
    %285 = vector.broadcast %284 : vector<1x3xf32> to vector<2x3xf32>
    %286 = arith.addf %283, %285 : vector<2x3xf32>
    %c0_147 = arith.constant 0 : index
    %c0_148 = arith.constant 0 : index
    %287 = vector.load %arg34[%c0_147, %c0_148] : memref<2x3xf32, #tpu.memory_space<vmem>>, vector<2x3xf32>
    tpu.vector_store %arg34[%c0_147, %c0_148], %286 {strides = array<i32>} : memref<2x3xf32, #tpu.memory_space<vmem>>, vector<2x3xf32>,
    return
  }
}

</mosaic_0001>

<bundles_post_ra>
// kernel: net_forward.1
= control target key start
LH: loop header
LB: loop body
LE: loop exit
PB: predicated region body
PF: predicated region fallthrough
CT: control target
= control target key end

     0   :  { %s1467_s6 = smov 1   ;;  %s1468_s10 = smov 2   ;;  %s1920_s0 = inlined_call_operand.smem [shape: u32[35], index: -1, kind: input, shape index: {}] }
   0x1   :  { %s1514_s5 = sld [smem:[%s1920_s0]]   ;;  %s1469_s14 = smov 3  }
   0x2   :  { %s1519_s9 = sld [smem:[%s1920_s0 + %s1467_s6]]   ;;  %s1470_s18 = smov 4  }
   0x3   :  { %s1524_s13 = sld [smem:[%s1920_s0 + %s1468_s10]]   ;;  %s1471_s22 = smov 5  }
   0x4   :  { %s1529_s17 = sld [smem:[%s1920_s0 + %s1469_s14]]   ;;  %s1472_s26 = smov 6  }
   0x5   :  { %s1534_s21 = sld [smem:[%s1920_s0 + %s1470_s18]]   ;;  %s1473_s30 = smov 7  }
   0x6   :  { %s1539_s25 = sld [smem:[%s1920_s0 + %s1471_s22]]   ;;  %s1474_s4 = smov 8  }
   0x7   :  { %s1544_s29 = sld [smem:[%s1920_s0 + %s1472_s26]]   ;;  %s1475_s10 = smov 9  }
   0x8   :  { %s1549_s3 = sld [smem:[%s1920_s0 + %s1473_s30]]   ;;  %s1476_s15 = smov 10  }
   0x9   :  { %s1554_s8 = sld [smem:[%s1920_s0 + %s1474_s4]]   ;;  %s1477_s20 = smov 11  }
   0xa   :  { %s1559_s14 = sld [smem:[%s1920_s0 + %s1475_s10]]   ;;  %s1478_s26 = smov 12  }
   0xb   :  { %s1564_s19 = sld [smem:[%s1920_s0 + %s1476_s15]]   ;;  %s1479_s1 = smov 13  }
   0xc   :  { %s1569_s24 = sld [smem:[%s1920_s0 + %s1477_s20]]   ;;  %s1480_s7 = smov 14  }
   0xd   :  { %s1574_s30 = sld [smem:[%s1920_s0 + %s1478_s26]]   ;;  %s1481_s15 = smov 15  }
   0xe   :  { %s1579_s6 = sld [smem:[%s1920_s0 + %s1479_s1]]   ;;  %s1482_s22 = smov 16  }
   0xf   :  { %s1584_s12 = sld [smem:[%s1920_s0 + %s1480_s7]]   ;;  %s1483_s28 = smov 17  }
  0x10   :  { %s1589_s20 = sld [smem:[%s1920_s0 + %s1481_s15]]   ;;  %s1484_s7 = smov 18  }
  0x11   :  { %s1594_s27 = sld [smem:[%s1920_s0 + %s1482_s22]]   ;;  %s1485_s15 = smov 19  }
  0x12   :  { %s1599_s4 = sld [smem:[%s1920_s0 + %s1483_s28]]   ;;  %s1486_s22 = smov 20  }
  0x13   :  { %s1487_s28 = smov 21  }
  0x15   :  { %1929 = sst [smem:[#allocation8_spill]] %s1584_s12 }
  0x16   :  { %1930 = sst [smem:[#allocation9_spill]] %s1589_s20 }
  0x17   :  { %1931 = sst [smem:[#allocation10_spill]] %s1594_s27 }
  0x18   :  { %1932 = sst [smem:[#allocation11_spill]] %s1599_s4 }
  0x19   :  { %s1604_s12 = sld [smem:[%s1920_s0 + %s1484_s7]]   ;;  %s1488_s7 = smov 22  }
  0x1a   :  { %s1609_s20 = sld [smem:[%s1920_s0 + %s1485_s15]]   ;;  %s1489_s15 = smov 23  }
  0x1b   :  { %s1614_s27 = sld [smem:[%s1920_s0 + %s1486_s22]]   ;;  %s1490_s22 = smov 24  }
  0x1c   :  { %s1619_s4 = sld [smem:[%s1920_s0 + %s1487_s28]]   ;;  %s1491_s28 = smov 25  }
  0x1f   :  { %1933 = sst [smem:[#allocation12_spill]] %s1604_s12 }
  0x20   :  { %1934 = sst [smem:[#allocation13_spill]] %s1609_s20 }
  0x21   :  { %1935 = sst [smem:[#allocation14_spill]] %s1614_s27 }
  0x22   :  { %1936 = sst [smem:[#allocation15_spill]] %s1619_s4 }
  0x23   :  { %s1624_s12 = sld [smem:[%s1920_s0 + %s1488_s7]]   ;;  %s1492_s7 = smov 26  }
  0x24   :  { %s1629_s20 = sld [smem:[%s1920_s0 + %s1489_s15]]   ;;  %s1493_s15 = smov 27  }
  0x25   :  { %s1634_s27 = sld [smem:[%s1920_s0 + %s1490_s22]]   ;;  %s1494_s22 = smov 28  }
  0x26   :  { %s1639_s4 = sld [smem:[%s1920_s0 + %s1491_s28]]   ;;  %s1495_s28 = smov 29  }
  0x29   :  { %1937 = sst [smem:[#allocation16_spill]] %s1624_s12 }
  0x2a   :  { %1938 = sst [smem:[#allocation17_spill]] %s1629_s20 }
  0x2b   :  { %1939 = sst [smem:[#allocation18_spill]] %s1634_s27 }
  0x2c   :  { %1940 = sst [smem:[#allocation19_spill]] %s1639_s4 }
  0x2d   :  { %s1644_s12 = sld [smem:[%s1920_s0 + %s1492_s7]]   ;;  %s1496_s7 = smov 30  }
  0x2e   :  { %s1649_s20 = sld [smem:[%s1920_s0 + %s1493_s15]]   ;;  %s1497_s15 = smov 31  }
  0x2f   :  { %s1654_s27 = sld [smem:[%s1920_s0 + %s1494_s22]]   ;;  %s1498_s22 = smov 32  }
  0x30   :  { %s1659_s4 = sld [smem:[%s1920_s0 + %s1495_s28]]   ;;  %s1499_s28 = smov 33  }
  0x33   :  { %1941 = sst [smem:[#allocation20_spill]] %s1644_s12 }
  0x34   :  { %1942 = sst [smem:[#allocation21_spill]] %s1649_s20 }
  0x35   :  { %1943 = sst [smem:[#allocation22_spill]] %s1654_s27 }
  0x36   :  { %1944 = sst [smem:[#allocation23_spill]] %s1659_s4 }
  0x37   :  { %s1664_s12 = sld [smem:[%s1920_s0 + %s1496_s7]]   ;;  %s1500_s7 = smov 34  }
  0x38   :  { %s1669_s20 = sld [smem:[%s1920_s0 + %s1497_s15]]  }
  0x39   :  { %s1674_s27 = sld [smem:[%s1920_s0 + %s1498_s22]]  }
  0x3a   :  { %s1679_s4 = sld [smem:[%s1920_s0 + %s1499_s28]]  }
  0x3d   :  { %1945 = sst [smem:[#allocation24_spill]] %s1664_s12 }
  0x3e   :  { %s1684_s12 = sld [smem:[%s1920_s0 + %s1500_s7]]  }
  0x3f   :  { %74 = vsyncpa [#allocation4], 0 }
  0x40   :  { %75 = vsyncpa [#allocation3], 0  ;;  %s81_s15 = sshll.u32 %s1514_s5, 4  ;;  %s1431_s22 = scalar_lea.vmem %s1514_s5, 1  ;;  %s82_s15 = int_to_ptr.vmem [resolvable:$true] %s81_s15 }
  0x41   :  { %s1427_s16 = sshra.s32 %s82_s15, 4  ;;  %s1428_s16 = int_to_ptr.vmem [resolvable:$true] %s1427_s16 }
  0x42   :  { %s1429_s18 = scalar_lea.vmem %s1428_s16, 1  ;;  %p1432_p1 = scmp.lt.s32.totalorder %s1428_s16, %s1514_s5 }
  0x43   :  { %p1430_p0 = scmp.ne.s32.totalorder %s1428_s16, %s1429_s18  ;;  %p1433_p2 = scmp.lt.s32.totalorder %s1431_s22, %s1429_s18 }
  0x45   :  { %p1434_p3 = por %p1433_p2, %p1432_p1 }
  0x47   :  { %p1435_p4 = pnand %p1434_p3, %p1430_p0 }
  0x49   :  { %1438 = shalt.err (!%p1435_p4)
}
  0x4a   :  { %s1501_s23 = smov [#allocation2]  }
  0x4b   :  { %84 = dma.vmem_to_smem %s82_s15, 16, %s1501_s23, [#allocation4]  }
  0x4c   :  { %1463 = dma.done.wait [#allocation4], 16  }
  0x4d   :  { %1464 = vsyncadd [#allocation4], 4294967280 }
  0x4e   :  { %155 = sfence }
  0x4f   :  { %v159_v0 = vld [vmem:[%s1524_s13] sm:$0xff]  ;;  %v160_v1 = vld [vmem:[%s1524_s13 + $0x8] sm:$0xff]  ;;  %vm168_vm0 = vcmask 130048   ;;  %vm213_vm1 = vcmask 1040384   ;;  %s161_s0 = sld [smem:[#allocation2]]  ;;  %vm209_vm2 = vcmask 146432  }
  0x50   :  { %v1692_v2 = vld [vmem:[%s1519_s9] sm:$0xff]  ;;  %v162_v3 = vpack.c.bf16 %v160_v1, %v159_v0  ;;  %v195_v4 = vld [vmem:[%s1529_s17 + $0x8] sm:$0x1]  ;;  %vm254_vm3 = vcmask 261120   ;;  %s1263_s9 = sld [smem:[#allocation2 + $0x1]]  ;;  %s1503_s26 = smov 64  }
  0x51   :  { %v205_v5 = vunpack.c.l.b16 %v195_v4  ;;  %v1326_v8 = vld [vmem:[%s1529_s17] sm:$0xff]  ;;  %v1328_v17 = vld [vmem:[%s1539_s25 + $0x8] sm:$0xff]  ;;  %s1946_s17 = sld [smem:[#allocation8_spill]]  ;;  %s1504_s7 = smov 32   ;;  %vm672_vm9 = vcmask 123904  }
  0x52   :  { %179 = vmatpush.bf16.msra.mxu0 %v162_v3  ;;  %264 = vmatpush.bf16.msra.mxu2 %v1328_v17  ;;  %v1327_v18 = vld [vmem:[%s1539_s25] sm:$0xff]  ;;  %v1330_v41 = vld [vmem:[%s1559_s14 + $0x8] sm:$0xff]  ;;  %s1948_s25 = sld [smem:[#allocation17_spill]]  ;;  %s1505_s22 = smov [#allocation5]  }
  0x53   :  { %v207_v6 = vpack.c.b16 %v205_v5, %v205_v5  ;;  %v1376_v20 = vld [vmem:[%s1534_s21] ss:$0 sm:$0xff]  ;;  %v1332_v51 = vld [vmem:[%s1569_s24 + $0x8] sm:$0xff]  ;;  %s1947_s21 = sld [smem:[#allocation9_spill]]  ;;  %s1198_s23 = sshll.u32 %s1505_s22, 4  ;;  %s1199_s23 = int_to_ptr.vmem [resolvable:$true] %s1198_s23 }
  0x54   :  { %v1377_v27 = vld [vmem:[%s1544_s29] ss:$0 sm:$0xff]  ;;  %s1949_s29 = sld [smem:[#allocation18_spill]] }
  0x55   :  { %1248 = vmatmul.msk.bf16.vlgmr.msra.gmra.mxu0 %vm168_vm0, %v1692_v2  ;;  %v215_v7 = vsel %vm213_vm1, %v207_v6, 0  ;;  %s186_s5 = sadd.f32 1.0, %s161_s0  ;;  %v1378_v31 = vld [vmem:[%s1549_s3] ss:$0 sm:$0xff]  ;;  %s1200_s0 = sshll.u32 %s1684_s12, 4  ;;  %s1201_s0 = int_to_ptr.hbm [resolvable:$true] %s1200_s0 }
  0x56   :  { %223 = vmatpush.bf16.msra.mxu1 %v215_v7  ;;  %265 = vmatpush.bf16.msra.mxu2 %v1327_v18  ;;  %v1379_v36 = vld [vmem:[%s1554_s8] ss:$0 sm:$0xff]  ;;  %s302_s13 = sadd.f32 1.0, %s1263_s9 }
  0x57   :  { %v187_v10 = vstv %s186_s5  ;;  %338 = vmatpush.bf16.msrb.mxu0 %v1330_v41  ;;  %v1329_v42 = vld [vmem:[%s1559_s14] sm:$0xff]  ;;  %s1950_s3 = sld [smem:[#allocation16_spill]]  ;;  %s1455_s5 = scalar_lea.hbm %s1684_s12, 2 }
  0x58   :  { %v188_v11 = vmul.f32 %v187_v10, %v159_v0  ;;  %v189_v12 = vmul.f32 %v187_v10, %v160_v1  ;;  %v303_v44 = vstv %s302_s13  ;;  %v1331_v52 = vld [vmem:[%s1569_s24] sm:$0xff]  ;;  %s1283_s8 = sld [smem:[#allocation2 + $0x2]] }
  0x59   :  { %v1380_v54 = vld [vmem:[%s1564_s19] ss:$0 sm:$0xff]  ;;  %s1951_s19 = sld [smem:[#allocation11_spill]] }
  0x5a   :  { %224 = vmatpush.bf16.msra.mxu1 %v1326_v8  ;;  %v1381_v61 = vld [vmem:[%s1574_s30] ss:$0 sm:$0xff]  ;;  %v1747_v17 = vld [vmem:[%s1949_s29 + $0x10] sm:$0xff]  ;;  %s1952_s24 = sld [smem:[#allocation10_spill]] }
  0x5b   :  { %339 = vmatpush.bf16.msrb.mxu0 %v1329_v42  ;;  %v1382_v1 = vld [vmem:[%s1579_s6] ss:$0 sm:$0xff]  ;;  %s1953_s30 = sld [smem:[#allocation19_spill]] }
  0x5c   :  { %v1383_v6 = vld [vmem:[%s1946_s17] ss:$0 sm:$0xff]  ;;  %s1954_s6 = sld [smem:[#allocation20_spill]] }
  0x5d   :  { %v1753_v18 = vld [vmem:[%s1950_s3 + $0x18] sm:$0xff]  ;;  %s1955_s28 = sld [smem:[#allocation12_spill]] }
  0x5e   :  { %s418_s14 = sadd.f32 1.0, %s1283_s8 }
  0x5f   :  { %s1956_s1 = sld [smem:[#allocation13_spill]] }
  0x60   :  { %s1957_s2 = sld [smem:[#allocation14_spill]] }
  0x61   :  { %v531_v42 = vld [vmem:[%s1953_s30] sm:$0x1]  ;;  %s1958_s10 = sld [smem:[#allocation15_spill]] }
  0x62   :  { %s1959_s11 = sld [smem:[#allocation21_spill]] }
  0x63   :  { %s1960_s15 = sld [smem:[#allocation22_spill]] }
  0x64   :  { %s1961_s16 = sld [smem:[#allocation24_spill]] }
  0x65   :  { %s1962_s18 = sld [smem:[#allocation23_spill]] }
  0xd2   :  { %v181_v9 = vpop.f32.mrf.mxu0 }
  0xd3   :  { %v190_v14 = vadd.f32 %v188_v11, %v181_v9 }
  0xda   :  { %v183_v13 = vpop.f32.mrf.mxu0 }
  0xdb   :  { %v191_v15 = vadd.f32 %v189_v12, %v183_v13  ;;  %v1334_v12 = vld [vmem:[%s1947_s21 + $0x8] sm:$0xff]  ;;  %v1333_v13 = vld [vmem:[%s1947_s21] sm:$0xff] }
  0xdc   :  { %454 = vmatpush.bf16.msrb.mxu2 %v1334_v12 }
  0xdd   :  { %v192_v16 = vpack.c.bf16 %v191_v15, %v190_v14  ;;  %v1736_v14 = vld [vmem:[%s1948_s25 + $0x18] sm:$0xff]  ;;  %v1739_v15 = vld [vmem:[%s1948_s25 + $0x10] sm:$0xff] }
  0xdf   :  { %1253 = vmatmul.msk.bf16.vlgmr.msra.gmra.mxu1 %vm209_vm2, %v192_v16  ;;  %v1742_v16 = vld [vmem:[%s1949_s29 + $0x18] sm:$0xff] }
  0xe0   :  { %455 = vmatpush.bf16.msrb.mxu2 %v1333_v13 }
 0x15c   :  { %v226_v19 = vpop.f32.mrf.mxu1 }
 0x15d   :  { %v227_v21 = vadd.f32 %v1376_v20, %v226_v19  ;;  %v1756_v19 = vld [vmem:[%s1949_s29 + $0x8] sm:$0xff] }
 0x15f   :  { %v231_v24 = vmax.f32 %v227_v21, 0.0  ;;  %v523_v21 = vld [vmem:[%s1948_s25] sm:$0xff] }
 0x164   :  { %v228_v22 = vpop.f32.mrf.mxu1 }
 0x165   :  { %v229_v23 = vadd.f32 %v1376_v20, %v228_v22  ;;  %v1761_v20 = vld [vmem:[%s1950_s3 + $0x10] sm:$0xff]  ;;  %v1766_v22 = vld [vmem:[%s1949_s29] sm:$0xff] }
 0x167   :  { %v232_v25 = vmax.f32 %v229_v23, 0.0  ;;  %v1502_v23 = vmov 0.0  }
 0x169   :  { %v233_v26 = vpack.c.bf16 %v232_v25, %v231_v24  ;;  %v1773_v24 = vld [vmem:[%s1950_s3 + $0x8] sm:$0xff]  ;;  %v1776_v25 = vld [vmem:[%s1950_s3] sm:$0xff] }
 0x16b   :  { %1262 = vmatmul.msk.bf16.vlgmr.msra.gmra.mxu2 %vm254_vm3, %v233_v26 }
 0x16c   :  { %589 = vmatpush.msra.mxu2 %v1742_v16 }
 0x16e   :  { %590 = vmatpush.msra.mxu2 %v1747_v17 }
 0x170   :  { %591 = vmatpush.msra.mxu2 %v1756_v19 }
 0x172   :  { %592 = vmatpush.msra.mxu2 %v1766_v22 }
 0x1ee   :  { %v267_v28 = vpop.f32.mrf.mxu2 }
 0x1ef   :  { %v268_v29 = vadd.f32 %v1377_v27, %v267_v28 }
 0x1f1   :  { %v272_v30 = vmax.f32 %v268_v29, 0.0 }
 0x1f3   :  { %v278_v34 = vmul.f32 %v1378_v31, %v272_v30 }
 0x1f5   :  { %v1705_v38 = vadd.f32 %v1379_v36, %v278_v34  ;;  %v1336_v34 = vld [vmem:[%s1951_s19 + $0x8] sm:$0xff] }
 0x1f6   :  { %v269_v32 = vpop.f32.mrf.mxu2  ;;  %494 = vmatpush.bf16.msra.mxu0 %v1336_v34 }
 0x1f7   :  { %v270_v33 = vadd.f32 %v1377_v27, %v269_v32  ;;  %v304_v45 = vmul.f32 %v303_v44, %v1705_v38  ;;  %v419_v27 = vstv %s418_s14 }
 0x1f9   :  { %v273_v35 = vmax.f32 %v270_v33, 0.0 }
 0x1fb   :  { %v279_v37 = vmul.f32 %v1378_v31, %v273_v35  ;;  %v1335_v35 = vld [vmem:[%s1951_s19] sm:$0xff] }
 0x1fc   :  { %495 = vmatpush.bf16.msra.mxu0 %v1335_v35 }
 0x1fd   :  { %v1707_v39 = vadd.f32 %v1379_v36, %v279_v37  ;;  %v1384_v37 = vld [vmem:[%s1952_s24] ss:$0 sm:$0xff] }
 0x1ff   :  { %v287_v40 = vpack.c.bf16 %v1707_v39, %v1705_v38  ;;  %v305_v46 = vmul.f32 %v303_v44, %v1707_v39 }
 0x201   :  { %295 = vmatpush.bf16.msra.mxu3 %v287_v40 }
 0x204   :  { %1264 = vmatmul.msk.bf16.vlgmr.msra.gmra.mxu3 %vm168_vm0, %v1692_v2 }
 0x205   :  { %378 = vmatpush.bf16.msrb.mxu3 %v1332_v51 }
 0x209   :  { %379 = vmatpush.bf16.msrb.mxu3 %v1331_v52 }
 0x20d   :  { %549 = vmatpush.msra.mxu3 %v1736_v14 }
 0x20f   :  { %550 = vmatpush.msra.mxu3 %v1739_v15 }
 0x287   :  { %v297_v43 = vpop.f32.mrf.mxu3 }
 0x288   :  { %v306_v48 = vadd.f32 %v304_v45, %v297_v43  ;;  %v532_v43 = vld [vmem:[%s1954_s6] sm:$0x1] }
 0x28f   :  { %v299_v47 = vpop.f32.mrf.mxu3 }
 0x290   :  { %v307_v49 = vadd.f32 %v305_v46, %v299_v47 }
 0x292   :  { %v308_v50 = vpack.c.bf16 %v307_v49, %v306_v48  ;;  %v533_v49 = vadd.f32 %v532_v43, %v531_v42 }
 0x294   :  { %1273 = vmatmul.msk.bf16.vlgmr.msrb.gmra.mxu0 %vm254_vm3, %v308_v50  ;;  %v1796_v52 = vperm.slane %v533_v49, 0 }
 0x295   :  { %756 = vmatpush.msrb.mxu0 %v1753_v18 }
 0x297   :  { %757 = vmatpush.msrb.mxu0 %v1761_v20 }
 0x299   :  { %758 = vmatpush.msrb.mxu0 %v1773_v24 }
 0x29b   :  { %759 = vmatpush.msrb.mxu0 %v1776_v25 }
 0x311   :  { %v341_v53 = vpop.f32.mrf.mxu0 }
 0x312   :  { %v342_v55 = vadd.f32 %v1380_v54, %v341_v53 }
 0x314   :  { %v346_v58 = vmax.f32 %v342_v55, 0.0 }
 0x319   :  { %v343_v56 = vpop.f32.mrf.mxu0 }
 0x31a   :  { %v344_v57 = vadd.f32 %v1380_v54, %v343_v56 }
 0x31c   :  { %v347_v59 = vmax.f32 %v344_v57, 0.0 }
 0x31e   :  { %v348_v60 = vpack.c.bf16 %v347_v59, %v346_v58 }
 0x320   :  { %1282 = vmatmul.msk.bf16.vlgmr.msrb.gmra.mxu3 %vm254_vm3, %v348_v60 }
 0x3a3   :  { %v381_v62 = vpop.f32.mrf.mxu3 }
 0x3a4   :  { %v382_v63 = vadd.f32 %v1381_v61, %v381_v62 }
 0x3a6   :  { %v386_v0 = vmax.f32 %v382_v63, 0.0 }
 0x3a8   :  { %v392_v5 = vmul.f32 %v1382_v1, %v386_v0 }
 0x3aa   :  { %v1725_v9 = vadd.f32 %v1383_v6, %v392_v5  ;;  %v1385_v5 = vld [vmem:[%s1955_s28] ss:$0 sm:$0xff] }
 0x3ab   :  { %v383_v3 = vpop.f32.mrf.mxu3 }
 0x3ac   :  { %v384_v4 = vadd.f32 %v1381_v61, %v383_v3  ;;  %v420_v28 = vmul.f32 %v419_v27, %v1725_v9 }
 0x3ae   :  { %v387_v7 = vmax.f32 %v384_v4, 0.0 }
 0x3b0   :  { %v393_v8 = vmul.f32 %v1382_v1, %v387_v7 }
 0x3b2   :  { %v1727_v10 = vadd.f32 %v1383_v6, %v393_v8 }
 0x3b4   :  { %v403_v11 = vpack.c.bf16 %v1727_v10, %v1725_v9  ;;  %v421_v29 = vmul.f32 %v419_v27, %v1727_v10  ;;  %v1387_v27 = vld [vmem:[%s1957_s2] ss:$0 sm:$0xff] }
 0x3b6   :  { %411 = vmatpush.bf16.msrb.mxu1 %v403_v11 }
 0x3b9   :  { %1284 = vmatmul.msk.bf16.vlgmr.msrb.gmra.mxu1 %vm168_vm0, %v1692_v2  ;;  %v1750_v2 = vld [vmem:[%s1948_s25 + $0x8] sm:$0xff] }
 0x3ba   :  { %569 = vmatpush.msra.mxu1 %v1753_v18  ;;  %551 = vmatpush.msra.mxu3 %v1750_v2 }
 0x3bc   :  { %570 = vmatpush.msra.mxu1 %v1761_v20  ;;  %552 = vmatpush.msra.mxu3 %v523_v21 }
 0x3bd   :  { %553 = vmatmul.f32.vlgmr.msra.gmra.mxu3 %v1502_v23 }
 0x3be   :  { %571 = vmatpush.msra.mxu1 %v1773_v24 }
 0x3c0   :  { %572 = vmatpush.msra.mxu1 %v1776_v25 }
 0x3c9   :  { %573 = vmatmul.f32.vlgmr.msra.gmra.mxu1 %v1502_v23 }
 0x436   :  { %v413_v26 = vpop.f32.mrf.mxu1 }
 0x437   :  { %v422_v31 = vadd.f32 %v420_v28, %v413_v26 }
 0x43e   :  { %v415_v30 = vpop.f32.mrf.mxu1 }
 0x43f   :  { %v423_v32 = vadd.f32 %v421_v29, %v415_v30 }
 0x440   :  { %v554_v45 = vpop.f32.mrf.mxu3 }
 0x441   :  { %v424_v33 = vpack.c.bf16 %v423_v32, %v422_v31  ;;  %v401_v31 = vmax.f32 %v1707_v39, %v1727_v10 }
 0x443   :  { %1293 = vmatmul.msk.bf16.vlgmr.msrb.gmra.mxu2 %vm254_vm3, %v424_v33  ;;  %v400_v33 = vmax.f32 %v1705_v38, %v1725_v9 }
 0x444   :  { %736 = vmatpush.msrb.mxu2 %v1736_v14 }
 0x446   :  { %737 = vmatpush.msrb.mxu2 %v1739_v15  ;;  %v574_v46 = vpop.f32.mrf.mxu1 }
 0x447   :  { %v575_v51 = vadd.f32 %v574_v46, %v554_v45 }
 0x448   :  { %738 = vmatpush.msrb.mxu2 %v1750_v2 }
 0x44a   :  { %739 = vmatpush.msrb.mxu2 %v523_v21 }
 0x453   :  { %593 = vmatmul.f32.vlgmr.msra.gmra.mxu2 %v1502_v23 }
 0x4c6   :  { %v457_v36 = vpop.f32.mrf.mxu2 }
 0x4c7   :  { %v458_v40 = vadd.f32 %v1384_v37, %v457_v36 }
 0x4c9   :  { %v462_v47 = vmax.f32 %v458_v40, 0.0 }
 0x4ce   :  { %v459_v41 = vpop.f32.mrf.mxu2 }
 0x4cf   :  { %v460_v44 = vadd.f32 %v1384_v37, %v459_v41  ;;  %v1846_v41 = vld [vmem:[%s1958_s10] sm:$0x3] }
 0x4d0   :  { %vm670_vm8 = vcmp.gt.f32.partialorder %v1846_v41, 0.5 }
 0x4d1   :  { %v463_v48 = vmax.f32 %v460_v44, 0.0 }
 0x4d3   :  { %v464_v50 = vpack.c.bf16 %v463_v48, %v462_v47 }
 0x4d5   :  { %1302 = vmatmul.msk.bf16.vlgmr.msra.gmra.mxu0 %vm254_vm3, %v464_v50 }
 0x4d6   :  { %v594_v53 = vpop.f32.mrf.mxu2  ;;  %912 = vmatpush.msra.mxu0 %v1736_v14 }
 0x4d7   :  { %v597_v54 = vadd.f32 %v594_v53, %v575_v51 }
 0x4d8   :  { %913 = vmatpush.msra.mxu0 %v1739_v15 }
 0x4d9   :  { %v601_v55 = vadd.f32 %v1796_v52, %v597_v54 }
 0x4da   :  { %914 = vmatpush.msra.mxu0 %v1750_v2  ;;  %v1386_v2 = vld [vmem:[%s1956_s1] ss:$0 sm:$0xff] }
 0x4db   :  { %1391 = vtanh.f32 %v601_v55  ;;  %v602_v57 = vsub.f32 0.0, %v601_v55 }
 0x4dc   :  { %915 = vmatpush.msra.mxu0 %v523_v21 }
 0x4dd   :  { %v603_v58 = vmul.f32 1.442695, %v602_v57 }
 0x4df   :  { %1393 = vpow2.f32 %v603_v58 }
 0x4e1   :  { %v1392_v56 = vpop.eup %1391 }
 0x4e2   :  { %624 = vrot.lane.b32.xlu0 %v1392_v56, %s1503_s26 }
 0x4e5   :  { %v1394_v59 = vpop.eup %1393 }
 0x4e6   :  { %v605_v60 = vadd.f32 1.0, %v1394_v59 }
 0x4e8   :  { %1395 = vrcp.f32 %v605_v60  ;;  %v617_v3 = vand.u32 2147483648, %v605_v60  ;;  %vm611_vm5 = vweird.f32 %v605_v60  ;;  %v615_v4 = vand.u32 2147483647, %v605_v60 }
 0x4ea   :  { %v618_v8 = vor.u32 1.1754944e-38, %v617_v3  ;;  %vm616_vm7 = vcmp.eq.f32.partialorder %v615_v4, 8.507059e+37 }
 0x4ee   :  { %v1396_v61 = vpop.eup %1395 }
 0x4ef   :  { %v607_v62 = vmul.f32 %v1396_v61, %v605_v60  ;;  %vm612_vm4 = vweird.f32 %v1396_v61 }
 0x4f0   :  { %vm613_vm6 = vmor %vm611_vm5, %vm612_vm4 }
 0x4f1   :  { %v608_v63 = vsub.f32 1.0, %v607_v62 }
 0x4f3   :  { %v609_v0 = vmul.f32 %v1396_v61, %v608_v63 }
 0x4f5   :  { %v610_v1 = vadd.f32 %v1396_v61, %v609_v0 }
 0x4f7   :  { %v614_v6 = vsel %vm613_vm6, %v1396_v61, %v610_v1 }
 0x4f8   :  { %v619_v12 = vsel %vm616_vm7, %v618_v8, %v614_v6 }
 0x4f9   :  { %v622_v38 = vmul.f32 0.0, %v619_v12 }
 0x552   :  { %v497_v7 = vpop.f32.mrf.mxu0 }
 0x553   :  { %v498_v13 = vadd.f32 %v1385_v5, %v497_v7 }
 0x554   :  { %v625_v11 = vpop.permute.xlu0 %624 }
 0x555   :  { %v627_v14 = vmul.f32 %v625_v11, %v619_v12  ;;  %v502_v15 = vmax.f32 %v498_v13, 0.0 }
 0x557   :  { %629 = vrot.lane.b32.xlu0 %v627_v14, %s1504_s7  ;;  %v508_v26 = vmul.f32 %v1386_v2, %v502_v15 }
 0x559   :  { %v514_v30 = vadd.f32 %v1387_v27, %v508_v26 }
 0x55a   :  { %v499_v21 = vpop.f32.mrf.mxu0 }
 0x55b   :  { %v500_v23 = vadd.f32 %v1385_v5, %v499_v21  ;;  %v1813_v35 = vmax.f32 %v400_v33, %v514_v30 }
 0x55d   :  { %v503_v28 = vmax.f32 %v500_v23, 0.0 }
 0x55f   :  { %v509_v29 = vmul.f32 %v1386_v2, %v503_v28 }
 0x561   :  { %v515_v32 = vadd.f32 %v1387_v27, %v509_v29 }
 0x563   :  { %v1811_v34 = vmax.f32 %v401_v31, %v515_v32 }
 0x565   :  { %1303 = vmatpush.xpose.msk.msrb.mxu3 %vm254_vm3, %v1811_v34  ;;  %715 = vmatpush.msrb.mxu1 %v1811_v34 }
 0x566   :  { %891 = vmatpush.msra.mxu2 %v1811_v34 }
 0x567   :  { %716 = vmatpush.msrb.mxu1 %v1813_v35 }
 0x568   :  { %892 = vmatpush.msra.mxu2 %v1813_v35 }
 0x569   :  { %1310 = vmatpush.xpose.msk.msra.mxu1 %vm254_vm3, %v1811_v34  ;;  %1304 = vmatpush.xpose.msk.msrb.mxu3 %vm254_vm3, %v1813_v35 }
 0x56d   :  { %776 = vmatpush.msra.mxu3 %v1742_v16  ;;  %1311 = vmatpush.xpose.msk.msra.mxu1 %vm254_vm3, %v1813_v35 }
 0x56f   :  { %777 = vmatpush.msra.mxu3 %v1747_v17 }
 0x571   :  { %778 = vmatpush.msra.mxu3 %v1756_v19 }
 0x573   :  { %779 = vmatpush.msra.mxu3 %v1766_v22 }
 0x5c9   :  { %v630_v39 = vpop.permute.xlu0 %629 }
 0x5ca   :  { %v1831_v9 = vadd.f32 %v630_v39, %v622_v38 }
 0x5cc   :  { %1397 = vtanh.f32 %v1831_v9 }
 0x5d2   :  { %v1398_v10 = vpop.eup %1397 }
 0x5d3   :  { %635 = vrot.lane.b32.xlu1 %v1398_v10, %s1503_s26 }
 0x645   :  { %v636_v36 = vpop.permute.xlu1 %635 }
 0x646   :  { %v638_v37 = vmul.f32 %v636_v36, %v619_v12 }
 0x648   :  { %640 = vrot.lane.b32.xlu1 %v638_v37, %s1504_s7 }
 0x6ba   :  { %v641_v40 = vpop.permute.xlu1 %640 }
 0x6bb   :  { %1305 = vmatmul.msk.f32.vlgmr.msrb.gmra.mxu3 %vm254_vm3, %v641_v40  ;;  %1308 = vmatmul.msk.f32.vlgmr.msrb.gmra.mxu0 %vm254_vm3, %v641_v40 }
 0x6bc   :  { %1067 = vmatpush.msrb.mxu0 %v1811_v34  ;;  %932 = vmatpush.msrb.mxu3 %v1753_v18 }
 0x6be   :  { %1068 = vmatpush.msrb.mxu0 %v1813_v35  ;;  %933 = vmatpush.msrb.mxu3 %v1761_v20 }
 0x6c0   :  { %934 = vmatpush.msrb.mxu3 %v1773_v24 }
 0x6c2   :  { %935 = vmatpush.msrb.mxu3 %v1776_v25 }
 0x6c3   :  { %1309 = vmatmul.msk.f32.vlgmr.msra.gmra.mxu3 %vm254_vm3, %v641_v40 }
 0x738   :  { %v761_v61 = vpop.f32.mrf.mxu0 }
 0x73e   :  { %v667_v42 = vpop.f32.mrf.mxu3 }
 0x73f   :  { %v671_v43 = vsel %vm670_vm8, %v667_v42, -1e+30 }
 0x740   :  { %v673_v18 = vsel %vm672_vm9, %v671_v43, -inf }
 0x741   :  { %674 = vmax.xlane.f32.xlu2 %v673_v18 }
 0x746   :  { %v781_v0 = vpop.f32.mrf.mxu3 }
 0x7b4   :  { %v675_v44 = vpop.xlane.xlu2 %674 }
 0x7b5   :  { %v676_v20 = vsub.f32 %v671_v43, %v675_v44 }
 0x7b7   :  { %v677_v45 = vmul.f32 1.442695, %v676_v20 }
 0x7b9   :  { %1399 = vpow2.f32 %v677_v45 }
 0x7bf   :  { %v1400_v24 = vpop.eup %1399 }
 0x7c0   :  { %v679_v25 = vmul.f32 %v1400_v24, %v1846_v41 }
 0x7c2   :  { %v680_v46 = vsel %vm672_vm9, %v679_v25, 0.0 }
 0x7c3   :  { %681 = vadd.xlane.f32.xlu2 %v680_v46 }
 0x836   :  { %v682_v47 = vpop.xlane.xlu2 %681 }
 0x837   :  { %1401 = vrcp.f32 %v682_v47  ;;  %v694_v51 = vand.u32 2147483648, %v682_v47  ;;  %v692_v54 = vand.u32 2147483647, %v682_v47  ;;  %vm688_vm11 = vweird.f32 %v682_v47 }
 0x839   :  { %v695_v56 = vor.u32 1.1754944e-38, %v694_v51  ;;  %vm693_vm13 = vcmp.eq.f32.partialorder %v692_v54, 8.507059e+37 }
 0x83d   :  { %v1402_v48 = vpop.eup %1401 }
 0x83e   :  { %v684_v49 = vmul.f32 %v1402_v48, %v682_v47  ;;  %vm689_vm10 = vweird.f32 %v1402_v48 }
 0x83f   :  { %vm690_vm12 = vmor %vm688_vm11, %vm689_vm10 }
 0x840   :  { %v685_v50 = vsub.f32 1.0, %v684_v49 }
 0x842   :  { %v686_v53 = vmul.f32 %v1402_v48, %v685_v50 }
 0x844   :  { %v687_v55 = vadd.f32 %v1402_v48, %v686_v53 }
 0x846   :  { %v691_v57 = vsel %vm690_vm12, %v1402_v48, %v687_v55 }
 0x847   :  { %v696_v58 = vsel %vm693_vm13, %v695_v56, %v691_v57 }
 0x848   :  { %v697_v59 = vmul.f32 %v696_v58, %v679_v25 }
 0x84a   :  { %1306 = vmatmul.msk.f32.vlgmr.msrb.gmra.mxu1 %vm168_vm0, %v697_v59 }
 0x84b   :  { %952 = vmatpush.msrb.mxu1 %v1742_v16 }
 0x84d   :  { %953 = vmatpush.msrb.mxu1 %v1747_v17 }
 0x84f   :  { %954 = vmatpush.msrb.mxu1 %v1756_v19 }
 0x851   :  { %955 = vmatpush.msrb.mxu1 %v1766_v22 }
 0x8c7   :  { %v718_v60 = vpop.f32.mrf.mxu1 }
 0x8c8   :  { %1307 = vmatmul.msk.f32.vlgmr.msrb.gmra.mxu2 %vm254_vm3, %v718_v60 }
 0x8c9   :  { %1317 = vmatpush.xpose.msk.msrb.mxu2 %vm254_vm3, %v1811_v34 }
 0x8cd   :  { %1318 = vmatpush.xpose.msk.msrb.mxu2 %vm254_vm3, %v1813_v35 }
 0x94b   :  { %v741_v62 = vpop.f32.mrf.mxu2 }
 0x94c   :  { %v762_v63 = vadd.f32 %v761_v61, %v741_v62 }
 0x94e   :  { %v784_v16 = vadd.f32 %v781_v0, %v762_v63 }
 0x950   :  { %v785_v17 = vadd.f32 %v784_v16, %v1796_v52 }
 0x952   :  { %1403 = vtanh.f32 %v785_v17  ;;  %v786_v22 = vsub.f32 0.0, %v785_v17 }
 0x954   :  { %v787_v1 = vmul.f32 1.442695, %v786_v22 }
 0x956   :  { %1405 = vpow2.f32 %v787_v1 }
 0x958   :  { %v1404_v19 = vpop.eup %1403 }
 0x959   :  { %808 = vrot.lane.b32.xlu0 %v1404_v19, %s1503_s26 }
 0x95c   :  { %v1406_v3 = vpop.eup %1405 }
 0x95d   :  { %v789_v4 = vadd.f32 1.0, %v1406_v3 }
 0x95f   :  { %1407 = vrcp.f32 %v789_v4  ;;  %v801_v12 = vand.u32 2147483648, %v789_v4  ;;  %vm795_vm15 = vweird.f32 %v789_v4  ;;  %v799_v13 = vand.u32 2147483647, %v789_v4 }
 0x961   :  { %v802_v15 = vor.u32 1.1754944e-38, %v801_v12  ;;  %vm800_vm2 = vcmp.eq.f32.partialorder %v799_v13, 8.507059e+37  ;;  %v1076_v12 = vld [vmem:[%s1959_s11 + $0x18] sm:$0xff]  ;;  %v1075_v13 = vld [vmem:[%s1959_s11 + $0x10] sm:$0xff] }
 0x965   :  { %v1408_v5 = vpop.eup %1407 }
 0x966   :  { %v791_v6 = vmul.f32 %v1408_v5, %v789_v4  ;;  %vm796_vm14 = vweird.f32 %v1408_v5 }
 0x967   :  { %vm797_vm1 = vmor %vm795_vm15, %vm796_vm14 }
 0x968   :  { %v792_v7 = vsub.f32 1.0, %v791_v6 }
 0x96a   :  { %v793_v8 = vmul.f32 %v1408_v5, %v792_v7 }
 0x96c   :  { %v794_v11 = vadd.f32 %v1408_v5, %v793_v8 }
 0x96e   :  { %v798_v14 = vsel %vm797_vm1, %v1408_v5, %v794_v11  ;;  %vm1191_vm1 = vcmask 17408  }
 0x96f   :  { %v803_v21 = vsel %vm800_vm2, %v802_v15, %v798_v14  ;;  %v1074_v14 = vld [vmem:[%s1959_s11 + $0x8] sm:$0xff]  ;;  %v1073_v15 = vld [vmem:[%s1959_s11] sm:$0xff] }
 0x970   :  { %v806_v26 = vmul.f32 %v803_v21, %v1831_v9 }
 0x9cb   :  { %v809_v2 = vpop.permute.xlu0 %808 }
 0x9cc   :  { %v811_v23 = vmul.f32 %v809_v2, %v803_v21 }
 0x9ce   :  { %813 = vrot.lane.b32.xlu1 %v811_v23, %s1504_s7 }
 0xa40   :  { %v814_v27 = vpop.permute.xlu1 %813 }
 0xa41   :  { %v1868_v28 = vadd.f32 %v814_v27, %v806_v26 }
 0xa43   :  { %1409 = vtanh.f32 %v1868_v28 }
 0xa49   :  { %v1410_v29 = vpop.eup %1409 }
 0xa4a   :  { %819 = vrot.lane.b32.xlu2 %v1410_v29, %s1503_s26 }
 0xaa4   :  { %v820_v30 = vpop.permute.xlu2 %819 }
 0xaa5   :  { %v822_v31 = vmul.f32 %v820_v30, %v803_v21 }
 0xaa7   :  { %824 = vrot.lane.b32.xlu0 %v822_v31, %s1504_s7 }
 0xb19   :  { %v825_v32 = vpop.permute.xlu0 %824 }
 0xb1a   :  { %1312 = vmatmul.msk.f32.vlgmr.msra.gmra.mxu1 %vm254_vm3, %v825_v32  ;;  %1315 = vmatmul.msk.f32.vlgmr.msrb.gmra.mxu3 %vm254_vm3, %v825_v32 }
 0xb1b   :  { %1116 = vmatpush.msra.mxu1 %v1076_v12 }
 0xb1d   :  { %1117 = vmatpush.msra.mxu1 %v1075_v13 }
 0xb1f   :  { %1118 = vmatpush.msra.mxu1 %v1074_v14 }
 0xb21   :  { %1119 = vmatpush.msra.mxu1 %v1073_v15 }
 0xb22   :  { %1316 = vmatmul.msk.f32.vlgmr.msrb.gmra.mxu1 %vm254_vm3, %v825_v32 }
 0xb97   :  { %v845_v33 = vpop.f32.mrf.mxu1 }
 0xb98   :  { %v848_v34 = vsel %vm670_vm8, %v845_v33, -1e+30 }
 0xb99   :  { %v849_v35 = vsel %vm672_vm9, %v848_v34, -inf }
 0xb9a   :  { %850 = vmax.xlane.f32.xlu1 %v849_v35  ;;  %v1080_v35 = vld [vmem:[%s1960_s15 + $0x18] sm:$0xff] }
 0xb9b   :  { %1096 = vmatpush.msra.mxu3 %v1080_v35 }
 0xb9d   :  { %v937_v50 = vpop.f32.mrf.mxu3 }
 0xb9f   :  { %v957_v54 = vpop.f32.mrf.mxu1 }
 0xc0d   :  { %v851_v38 = vpop.xlane.xlu1 %850 }
 0xc0e   :  { %v852_v39 = vsub.f32 %v848_v34, %v851_v38  ;;  %v1079_v38 = vld [vmem:[%s1960_s15 + $0x10] sm:$0xff] }
 0xc0f   :  { %1097 = vmatpush.msra.mxu3 %v1079_v38 }
 0xc10   :  { %v853_v9 = vmul.f32 1.442695, %v852_v39  ;;  %v1078_v39 = vld [vmem:[%s1960_s15 + $0x8] sm:$0xff] }
 0xc11   :  { %1098 = vmatpush.msra.mxu3 %v1078_v39 }
 0xc12   :  { %1411 = vpow2.f32 %v853_v9 }
 0xc18   :  { %v1412_v10 = vpop.eup %1411 }
 0xc19   :  { %v855_v36 = vmul.f32 %v1412_v10, %v1846_v41 }
 0xc1b   :  { %v856_v37 = vsel %vm672_vm9, %v855_v36, 0.0 }
 0xc1c   :  { %857 = vadd.xlane.f32.xlu0 %v856_v37 }
 0xc8f   :  { %v858_v40 = vpop.xlane.xlu0 %857 }
 0xc90   :  { %1413 = vrcp.f32 %v858_v40  ;;  %v870_v44 = vand.u32 2147483648, %v858_v40  ;;  %v868_v45 = vand.u32 2147483647, %v858_v40  ;;  %vm864_vm5 = vweird.f32 %v858_v40 }
 0xc92   :  { %v871_v25 = vor.u32 1.1754944e-38, %v870_v44  ;;  %vm869_vm7 = vcmp.eq.f32.partialorder %v868_v45, 8.507059e+37 }
 0xc96   :  { %v1414_v42 = vpop.eup %1413 }
 0xc97   :  { %v860_v43 = vmul.f32 %v1414_v42, %v858_v40  ;;  %vm865_vm4 = vweird.f32 %v1414_v42 }
 0xc98   :  { %vm866_vm6 = vmor %vm864_vm5, %vm865_vm4 }
 0xc99   :  { %v861_v18 = vsub.f32 1.0, %v860_v43 }
 0xc9b   :  { %v862_v20 = vmul.f32 %v1414_v42, %v861_v18 }
 0xc9d   :  { %v863_v24 = vadd.f32 %v1414_v42, %v862_v20 }
 0xc9f   :  { %v867_v46 = vsel %vm866_vm6, %v1414_v42, %v863_v24  ;;  %v1077_v24 = vld [vmem:[%s1960_s15] sm:$0xff] }
 0xca0   :  { %v872_v47 = vsel %vm869_vm7, %v871_v25, %v867_v46  ;;  %1099 = vmatpush.msra.mxu3 %v1077_v24  ;;  %v1133_v46 = vld [vmem:[%s1961_s16 + $0x18] sm:$0xff] }
 0xca1   :  { %v873_v48 = vmul.f32 %v872_v47, %v855_v36  ;;  %v1132_v47 = vld [vmem:[%s1961_s16 + $0x10] sm:$0xff] }
 0xca3   :  { %1313 = vmatmul.msk.f32.vlgmr.msra.gmra.mxu2 %vm168_vm0, %v873_v48  ;;  %v1131_v48 = vld [vmem:[%s1961_s16 + $0x8] sm:$0xff] }
 0xca4   :  { %1153 = vmatpush.msra.mxu2 %v1133_v46 }
 0xca6   :  { %1154 = vmatpush.msra.mxu2 %v1132_v47 }
 0xca8   :  { %1155 = vmatpush.msra.mxu2 %v1131_v48 }
 0xd26   :  { %v894_v49 = vpop.f32.mrf.mxu2 }
 0xd27   :  { %1314 = vmatmul.msk.f32.vlgmr.msra.gmra.mxu0 %vm254_vm3, %v894_v49  ;;  %v1130_v49 = vld [vmem:[%s1961_s16] sm:$0xff] }
 0xd28   :  { %1156 = vmatpush.msra.mxu2 %v1130_v49 }
 0xda4   :  { %v917_v51 = vpop.f32.mrf.mxu0 }
 0xda5   :  { %v938_v53 = vadd.f32 %v937_v50, %v917_v51  ;;  %v1388_v50 = vld [vmem:[%s1962_s18] ss:$0 sm:$0xff] }
 0xda7   :  { %v960_v55 = vadd.f32 %v957_v54, %v938_v53 }
 0xda9   :  { %v961_v56 = vadd.f32 %v960_v55, %v1796_v52 }
 0xdab   :  { %1415 = vtanh.f32 %v961_v56  ;;  %v962_v58 = vsub.f32 0.0, %v961_v56 }
 0xdad   :  { %v963_v59 = vmul.f32 1.442695, %v962_v58  ;;  %v1162_v58 = vld [vmem:[%s1674_s27] sm:$0xff] }
 0xdaf   :  { %1417 = vpow2.f32 %v963_v59  ;;  %v1389_v59 = vld [vmem:[%s1669_s20] ss:$0 sm:$0xff] }
 0xdb1   :  { %v1416_v57 = vpop.eup %1415 }
 0xdb2   :  { %984 = vrot.lane.b32.xlu2 %v1416_v57, %s1503_s26  ;;  %v1163_v57 = vld [vmem:[%s1674_s27 + $0x8] sm:$0xff]  ;;  %s1451_s27 = sshra.s32 %s1201_s0, 4  ;;  %s1452_s27 = int_to_ptr.hbm [resolvable:$true] %s1451_s27 }
 0xdb3   :  { %1185 = vmatpush.msra.mxu0 %v1163_v57  ;;  %s1453_s20 = scalar_lea.hbm %s1452_s27, 2  ;;  %p1456_p6 = scmp.lt.s32.totalorder %s1452_s27, %s1684_s12 }
 0xdb4   :  { %p1454_p5 = scmp.ne.s32.totalorder %s1452_s27, %s1453_s20  ;;  %p1457_p7 = scmp.lt.s32.totalorder %s1455_s5, %s1453_s20 }
 0xdb5   :  { %v1418_v60 = vpop.eup %1417  ;;  %1186 = vmatpush.msra.mxu0 %v1162_v58 }
 0xdb6   :  { %v965_v61 = vadd.f32 1.0, %v1418_v60  ;;  %p1458_p8 = por %p1457_p7, %p1456_p6 }
 0xdb8   :  { %1419 = vrcp.f32 %v965_v61  ;;  %v977_v19 = vand.u32 2147483648, %v965_v61  ;;  %vm971_vm11 = vweird.f32 %v965_v61  ;;  %v975_v52 = vand.u32 2147483647, %v965_v61  ;;  %p1459_p9 = pnand %p1458_p8, %p1454_p5 }
 0xdba   :  { %v978_v1 = vor.u32 1.1754944e-38, %v977_v19  ;;  %vm976_vm13 = vcmp.eq.f32.partialorder %v975_v52, 8.507059e+37 }
 0xdbe   :  { %v1420_v62 = vpop.eup %1419 }
 0xdbf   :  { %v967_v63 = vmul.f32 %v1420_v62, %v965_v61  ;;  %vm972_vm10 = vweird.f32 %v1420_v62 }
 0xdc0   :  { %vm973_vm12 = vmor %vm971_vm11, %vm972_vm10 }
 0xdc1   :  { %v968_v0 = vsub.f32 1.0, %v967_v63  ;;  %v1390_v63 = vld [vmem:[%s1679_s4] ss:$0 sm:$0xff] }
 0xdc3   :  { %v969_v16 = vmul.f32 %v1420_v62, %v968_v0 }
 0xdc5   :  { %v970_v17 = vadd.f32 %v1420_v62, %v969_v16 }
 0xdc7   :  { %v974_v22 = vsel %vm973_vm12, %v1420_v62, %v970_v17 }
 0xdc8   :  { %v979_v4 = vsel %vm976_vm13, %v978_v1, %v974_v22 }
 0xdc9   :  { %v982_v6 = vmul.f32 %v979_v4, %v1868_v28 }
 0xe0c   :  { %v985_v3 = vpop.permute.xlu2 %984 }
 0xe0d   :  { %v987_v5 = vmul.f32 %v985_v3, %v979_v4 }
 0xe0f   :  { %989 = vrot.lane.b32.xlu2 %v987_v5, %s1504_s7 }
 0xe69   :  { %v990_v7 = vpop.permute.xlu2 %989 }
 0xe6a   :  { %v992_v8 = vadd.f32 %v990_v7, %v982_v6 }
 0xe6c   :  { %1421 = vtanh.f32 %v992_v8 }
 0xe72   :  { %v1422_v11 = vpop.eup %1421 }
 0xe73   :  { %995 = vrot.lane.b32.xlu2 %v1422_v11, %s1503_s26 }
 0xecd   :  { %v996_v2 = vpop.permute.xlu2 %995 }
 0xece   :  { %v998_v21 = vmul.f32 %v996_v2, %v979_v4 }
 0xed0   :  { %1000 = vrot.lane.b32.xlu2 %v998_v21, %s1504_s7 }
 0xf2a   :  { %v1001_v23 = vpop.permute.xlu2 %1000 }
 0xf2b   :  { %1319 = vmatmul.msk.f32.vlgmr.msrb.gmra.mxu2 %vm254_vm3, %v1001_v23  ;;  %1322 = vmatmul.msk.f32.vlgmr.msra.gmra.mxu1 %vm254_vm3, %v1001_v23 }
 0xfa8   :  { %v1121_v51 = vpop.f32.mrf.mxu1 }
 0xfae   :  { %v1021_v26 = vpop.f32.mrf.mxu2 }
 0xfaf   :  { %v1024_v27 = vsel %vm670_vm8, %v1021_v26, -1e+30 }
 0xfb0   :  { %v1025_v28 = vsel %vm672_vm9, %v1024_v27, -inf }
 0xfb1   :  { %1026 = vmax.xlane.f32.xlu1 %v1025_v28 }
0x1024   :  { %v1027_v29 = vpop.xlane.xlu1 %1026 }
0x1025   :  { %v1028_v30 = vsub.f32 %v1024_v27, %v1027_v29 }
0x1027   :  { %v1029_v31 = vmul.f32 1.442695, %v1028_v30 }
0x1029   :  { %1423 = vpow2.f32 %v1029_v31 }
0x102f   :  { %v1424_v32 = vpop.eup %1423 }
0x1030   :  { %v1031_v33 = vmul.f32 %v1424_v32, %v1846_v41 }
0x1032   :  { %v1032_v34 = vsel %vm672_vm9, %v1031_v33, 0.0 }
0x1033   :  { %1033 = vadd.xlane.f32.xlu2 %v1032_v34 }
0x10a6   :  { %v1034_v9 = vpop.xlane.xlu2 %1033 }
0x10a7   :  { %1425 = vrcp.f32 %v1034_v9  ;;  %v1046_v40 = vand.u32 2147483648, %v1034_v9  ;;  %v1044_v41 = vand.u32 2147483647, %v1034_v9  ;;  %vm1040_vm9 = vweird.f32 %v1034_v9 }
0x10a9   :  { %v1047_v18 = vor.u32 1.1754944e-38, %v1046_v40  ;;  %vm1045_vm15 = vcmp.eq.f32.partialorder %v1044_v41, 8.507059e+37 }
0x10ad   :  { %v1426_v10 = vpop.eup %1425 }
0x10ae   :  { %v1036_v36 = vmul.f32 %v1426_v10, %v1034_v9  ;;  %vm1041_vm8 = vweird.f32 %v1426_v10 }
0x10af   :  { %vm1042_vm14 = vmor %vm1040_vm9, %vm1041_vm8 }
0x10b0   :  { %v1037_v37 = vsub.f32 1.0, %v1036_v36 }
0x10b2   :  { %v1038_v42 = vmul.f32 %v1426_v10, %v1037_v37 }
0x10b4   :  { %v1039_v43 = vadd.f32 %v1426_v10, %v1038_v42 }
0x10b6   :  { %v1043_v44 = vsel %vm1042_vm14, %v1426_v10, %v1039_v43 }
0x10b7   :  { %v1048_v20 = vsel %vm1045_vm15, %v1047_v18, %v1043_v44 }
0x10b8   :  { %v1049_v45 = vmul.f32 %v1048_v20, %v1031_v33 }
0x10ba   :  { %1320 = vmatmul.msk.f32.vlgmr.msrb.gmra.mxu0 %vm168_vm0, %v1049_v45 }
0x1137   :  { %v1070_v25 = vpop.f32.mrf.mxu0 }
0x1138   :  { %1321 = vmatmul.msk.f32.vlgmr.msra.gmra.mxu3 %vm254_vm3, %v1070_v25 }
0x11bb   :  { %v1101_v53 = vpop.f32.mrf.mxu3 }
0x11bc   :  { %v1122_v54 = vadd.f32 %v1121_v51, %v1101_v53 }
0x11be   :  { %v1128_v55 = vadd.f32 %v1388_v50, %v1122_v54 }
0x11c0   :  { %v1129_v56 = vmax.f32 %v1128_v55, 0.0 }
0x11c2   :  { %1323 = vmatmul.msk.f32.vlgmr.msra.gmra.mxu2 %vm254_vm3, %v1129_v56 }
0x1245   :  { %v1158_v60 = vpop.f32.mrf.mxu2 }
0x1246   :  { %v1159_v61 = vadd.f32 %v1389_v59, %v1158_v60 }
0x1248   :  { %v1161_v62 = vmax.f32 %v1159_v61, 0.0 }
0x124a   :  { %1324 = vmatmul.msk.f32.vlgmr.msra.gmra.mxu0 %vm168_vm0, %v1161_v62 }
0x12c7   :  { %v1188_v0 = vpop.f32.mrf.mxu0 }
0x12c8   :  { %v1189_v16 = vadd.f32 %v1390_v63, %v1188_v0 }
0x12ca   :  { %1192 = vst.msk [vmem:[#allocation5] sm:$0x3] %vm1191_vm1, %v1189_v16 }
0x12cb   :  { %1462 = shalt.err (!%p1459_p9)
}
0x12cc   :  { %1203 = dma.vmem_to_hbm [thread:$0]  %s1199_s23, 32, %s1201_s0, [#allocation3]  }
0x12cd   :  { %1465 = dma.done.wait [#allocation3], 32  }
0x12ce   :  { %1466 = vsyncadd [#allocation3], 4294967264 }
0x12cf   :  { %1208 = vsyncpa [#allocation3], 1 }
0x12d0   :  { %1209 = vsyncpa [#allocation4], 1 }

</bundles_post_ra>
